<compile_context>
chip_gen: v7x
topology: tpu7x:2x2x1
jax: 0.10.0
libtpu: 0.0.40
codegen_flags: <defaults>
</compile_context>

<pallas_src>
import jax
import jax.numpy as jnp
from jax import lax
from jax.experimental import pallas as pl
from jax.experimental.pallas import tpu as pltpu  # noqa: F401  (kept for TPU-specific knobs)

NEG_INF = -1e30
# Contract the last dims of both operands (A[M,K] x B[N,K] -> [M,N]); same dimension
# numbers the TPU flash-attention kernels use for q @ k^T.
_NT_DIMS = (((1,), (1,)), ((), ()))


# ----------------------------- fused Pallas kernel -----------------------------

def _make_fused_gat_kernel(layer_cfgs, n):
    """Build one kernel computing the entire multi-layer GAT forward (eval mode).

    Ref order: x, packed_mask, slab_0 ... slab_{L-1}, out.
    layer_cfgs is a static tuple of (fin, heads, fout, relu) -- layers/heads unroll at
    trace time.  Per-layer slab rows: [w (fin) | att_src band (H) | att_dst band (H) |
    sel band (H) | scale (1) | shift (1)], all of width H*F.
    """

    def kernel(x_ref, mask_ref, *rest):
        slab_refs = rest[:-1]
        o_ref = rest[-1]

        h_val = x_ref[...]                                     # [N, Fin] current activations

        for li, (fin, heads, fout, relu) in enumerate(layer_cfgs):
            slab = slab_refs[li]
            hf = heads * fout

            # --- carve the parameter slab (static row slices, only what this branch needs)
            w = slab[0:fin, :]                                  # [Fin, H*F]
            asrc = slab[fin:fin + heads, :]                     # [H, H*F] banded att_src
            adst = slab[fin + heads:fin + 2 * heads, :]         # [H, H*F] banded att_dst
            shift = slab[fin + 3 * heads + 1:fin + 3 * heads + 2, :]   # [1, H*F]

            # --- linear projection for ALL heads at once (MXU), lane-dense [N, H*F]
            xw = jnp.dot(h_val, w, preferred_element_type=jnp.float32)

            # --- attention logits for all heads via two small MXU matmuls
            a_src_hn = lax.dot_general(asrc, xw, _NT_DIMS,
                                       preferred_element_type=jnp.float32)   # [H, N]
            a_dst_nh = lax.dot_general(xw, adst, _NT_DIMS,
                                       preferred_element_type=jnp.float32)   # [N, H]

            if heads == 1:
                # [N,1] + [1,N] broadcasts straight to the [N,N] score block.
                s = a_dst_nh + a_src_hn
            else:
                # Pack all heads along lanes: block h occupies lanes [h*N, (h+1)*N).
                a_src_row = jnp.concatenate(
                    [a_src_hn[h:h + 1, :] for h in range(heads)], axis=1)     # [1, H*N]
                a_dst_pk = jnp.concatenate(
                    [jnp.broadcast_to(a_dst_nh[:, h:h + 1], (n, n)) for h in range(heads)],
                    axis=1)                                                   # [N, H*N]
                s = a_dst_pk + a_src_row

            # LeakyReLU(0.2) + additive adjacency mask (read from the ref where used).
            s = jnp.maximum(s, 0.2 * s) + mask_ref[:, 0:heads * n]

            if heads == 1:
                m = jnp.max(s, axis=-1, keepdims=True)
                p = jnp.exp(s - m)                               # masked entries underflow to 0
                l = jnp.sum(p, axis=-1, keepdims=True)
                # Deferred normalisation: un-normalised aggregate, then 64 reciprocals.
                out = jnp.dot(p, xw, preferred_element_type=jnp.float32) * (1.0 / l)
            else:
                sel = slab[fin + 2 * heads:fin + 3 * heads, :]   # [H, H*F] 0/1 column selectors
                # Segmented (per-head) row max over lane blocks, re-packed for one exp.
                m_pk = jnp.concatenate(
                    [jnp.broadcast_to(
                        jnp.max(s[:, h * n:(h + 1) * n], axis=-1, keepdims=True), (n, n))
                     for h in range(heads)], axis=1)             # [N, H*N]
                p = jnp.exp(s - m_pk)                            # one exp on full-width lanes

                # Deferred per-head normalisation factors, spread over each head's band.
                terms = []
                for h in range(heads):
                    l_h = jnp.sum(p[:, h * n:(h + 1) * n], axis=-1, keepdims=True)   # [N,1]
                    terms.append(sel[h:h + 1, :] * (1.0 / l_h))
                inv_band = terms[0]
                for t in terms[1:]:
                    inv_band = inv_band + t                      # [N, H*F]

                # Block-diagonal value stack: row block h holds xw restricted to band h.
                xw_stack = jnp.concatenate(
                    [xw * sel[h:h + 1, :] for h in range(heads)], axis=0)     # [H*N, H*F]
                out = jnp.dot(p, xw_stack, preferred_element_type=jnp.float32) * inv_band

            # Fused epilogue: GATConv bias + (inference) BatchNorm folded to scale/shift.
            if relu:
                scale = slab[fin + 3 * heads:fin + 3 * heads + 1, :]
                out = jnp.maximum(out * scale + shift, 0.0)
            else:
                out = out + shift                                # last layer: bias only
            h_val = out

        o_ref[...] = h_val

    return kernel


# ------------------------------ glue / wrappers ------------------------------

def _prepare_layers(conv_params, bn_params):
    """Parameter-only prep (cacheable): one row-stacked slab per layer + static config."""
    slabs, cfgs = [], []
    num_layers = len(conv_params)
    for li, cp in enumerate(conv_params):
        h, f = cp["att_src"].shape
        hf = h * f
        fin = cp["w"].shape[0]

        def banded(a):  # [H, F] -> [H, H*F], row h holds a[h] in columns [h*F:(h+1)*F]
            out = jnp.zeros((h, hf), jnp.float32)
            for i in range(h):
                out = out.at[i, i * f:(i + 1) * f].set(a[i])
            return out

        if li < num_layers - 1:
            bp = bn_params[li]
            scale = bp["gamma"] * jax.lax.rsqrt(bp["var"] + 1e-5)
            shift = (cp["bias"] - bp["mean"]) * scale + bp["beta"]
            relu = True
        else:
            scale = jnp.ones((hf,), jnp.float32)
            shift = cp["bias"]
            relu = False

        slab = jnp.concatenate([
            cp["w"].astype(jnp.float32),                          # rows [0, fin)
            banded(cp["att_src"]),                                # rows [fin, fin+H)
            banded(cp["att_dst"]),                                # rows [fin+H, fin+2H)
            banded(jnp.ones((h, f), jnp.float32)),                # rows [fin+2H, fin+3H)
            scale.reshape(1, hf).astype(jnp.float32),             # row  fin+3H
            shift.reshape(1, hf).astype(jnp.float32),             # row  fin+3H+1
        ], axis=0)
        slabs.append(slab)
        cfgs.append((fin, h, f, relu))

    out_dim = cfgs[-1][1] * cfgs[-1][2]
    max_heads = max(c[1] for c in cfgs)
    return slabs, tuple(cfgs), out_dim, max_heads


def build_fused_forward(conv_params, bn_params, n):
    slabs, cfgs, out_dim, max_heads = _prepare_layers(conv_params, bn_params)
    call = pl.pallas_call(
        _make_fused_gat_kernel(cfgs, n),
        out_shape=jax.ShapeDtypeStruct((n, out_dim), jnp.float32),
        # No grid / BlockSpecs: at N=64 the full problem (incl. the [N, Hmax*N] packed mask
        # and score blocks) fits in VMEM on v5e/v6e (128 MiB) and v7x (64 MiB) in one shot.
    )

    def forward(x, neg_mask):
        # Pre-tile the additive mask Hmax times along lanes so the kernel's packed score
        # block adds it directly; a layer with fewer heads reads a static lane-prefix.
        if max_heads > 1:
            mask_packed = jnp.concatenate([neg_mask] * max_heads, axis=1)
        else:
            mask_packed = neg_mask
        return call(x, mask_packed, *slabs)

    return forward


def gat_multilayer_forward(x, adj, conv_params, bn_params):
    # NOTE: masked softmax relies on adj containing self-loops (added below in main glue,
    # matching PyG GATConv add_self_loops=True) so every row has a finite max.
    neg_mask = jnp.where(adj > 0.0, 0.0, NEG_INF).astype(jnp.float32)
    return build_fused_forward(conv_params, bn_params, x.shape[0])(x, neg_mask)


# ------------------------- deterministic parameters -------------------------

def init_params(key, in_channels, hidden_channels, out_channels, num_layers, in_head, out_head):
    layer_shapes = [(in_channels, hidden_channels, in_head)]
    for _ in range(num_layers - 2):
        layer_shapes.append((hidden_channels * in_head, hidden_channels, in_head))
    layer_shapes.append((hidden_channels * in_head, out_channels, out_head))

    conv_params = []
    for (fin, fout, h) in layer_shapes:
        key, k1, k2, k3, k4 = jax.random.split(key, 5)
        scale = 1.0 / jnp.sqrt(jnp.float32(fin))
        conv_params.append(dict(
            w=jax.random.normal(k1, (fin, h * fout), jnp.float32) * scale,
            att_src=jax.random.normal(k2, (h, fout), jnp.float32) * 0.1,
            att_dst=jax.random.normal(k3, (h, fout), jnp.float32) * 0.1,
            bias=jax.random.normal(k4, (h * fout,), jnp.float32) * 0.01,
        ))

    bn_params = []
    c = hidden_channels * in_head
    for _ in range(num_layers - 1):
        key, k1, k2, k3, k4 = jax.random.split(key, 5)
        bn_params.append(dict(
            gamma=1.0 + 0.1 * jax.random.normal(k1, (c,), jnp.float32),
            beta=0.1 * jax.random.normal(k2, (c,), jnp.float32),
            mean=0.1 * jax.random.normal(k3, (c,), jnp.float32),
            var=1.0 + 0.1 * jnp.abs(jax.random.normal(k4, (c,), jnp.float32)),
        ))
    return conv_params, bn_params


# ------------------------------ pure-JAX reference ------------------------------

def _gat_conv_ref(x, adj, p):
    h, fout = p["att_src"].shape
    n = x.shape[0]
    xw = (x @ p["w"]).reshape(n, h, fout)
    a_src = jnp.sum(xw * p["att_src"][None], axis=-1)            # [N, H]
    a_dst = jnp.sum(xw * p["att_dst"][None], axis=-1)            # [N, H]
    scores = a_dst[:, None, :] + a_src[None, :, :]               # [Ndst, Nsrc, H]
    scores = jnp.where(scores > 0, scores, 0.2 * scores)
    mask = adj[:, :, None] > 0
    scores = jnp.where(mask, scores, -1e30)
    attn = jax.nn.softmax(scores, axis=1)
    attn = jnp.where(mask, attn, 0.0)
    out = jnp.einsum("dsh,shf->dhf", attn, xw)
    return out.reshape(n, h * fout) + p["bias"]


def _forward_ref(x, adj, conv_params, bn_params):
    for i, cp in enumerate(conv_params[:-1]):
        x = _gat_conv_ref(x, adj, cp)
        bp = bn_params[i]
        x = (x - bp["mean"]) * jax.lax.rsqrt(bp["var"] + 1e-5) * bp["gamma"] + bp["beta"]
        x = jnp.maximum(x, 0.0)
    return _gat_conv_ref(x, adj, conv_params[-1])


# ----------------------------------- main -----------------------------------

if __name__ == "__main__":
    key = jax.random.PRNGKey(0)
    N, E = 64, 256
    in_channels, hidden_channels, out_channels = 16, 8, 4
    num_layers, in_head, out_head = 3, 2, 1
    dropout = 0.5  # identity in eval mode

    key, kx, ks, kd, kp = jax.random.split(key, 5)
    x = jax.random.normal(kx, (N, in_channels), jnp.float32)
    src = jax.random.randint(ks, (E,), 0, N)
    dst = jax.random.randint(kd, (E,), 0, N)
    edge_index = jnp.stack([src, dst])                          # [2, E]: row0=src, row1=dst

    # densify: adj[dst, src] = 1, plus self-loops (GATConv default add_self_loops=True)
    adj = jnp.zeros((N, N), jnp.float32).at[dst, src].set(1.0)
    adj = jnp.maximum(adj, jnp.eye(N, dtype=jnp.float32))

    conv_params, bn_params = init_params(
        kp, in_channels, hidden_channels, out_channels, num_layers, in_head, out_head)

    out = jax.block_until_ready(gat_multilayer_forward(x, adj, conv_params, bn_params))
    ref = _forward_ref(x, adj, conv_params, bn_params)

    assert out.shape == (N, out_channels * out_head), out.shape
    assert jnp.allclose(out, ref, atol=1e-4, rtol=1e-4), float(jnp.max(jnp.abs(out - ref)))
    print("KERNEL_OK")
</pallas_src>

<mosaic_0001>
module attributes {stable_mosaic.version = 11 : i64} {
  func.func @kernel(%arg0: memref<64x16xf32, #tpu.memory_space<vmem>>, %arg1: memref<64x128xf32, #tpu.memory_space<vmem>>, %arg2: memref<24x16xf32, #tpu.memory_space<vmem>>, %arg3: memref<24x16xf32, #tpu.memory_space<vmem>>, %arg4: memref<21x4xf32, #tpu.memory_space<vmem>>, %arg5: memref<64x4xf32, #tpu.memory_space<vmem>>) attributes {dimension_semantics = [], scalar_prefetch = 0 : i64, scratch_operands = 0 : i64, tpu.core_type = #tpu.core_type<tc>} {
    %c0 = arith.constant 0 : index
    %c0_0 = arith.constant 0 : index
    %0 = vector.load %arg0[%c0, %c0_0] : memref<64x16xf32, #tpu.memory_space<vmem>>, vector<64x16xf32>
    %c0_1 = arith.constant 0 : index
    %c0_2 = arith.constant 0 : index
    %1 = vector.load %arg2[%c0_1, %c0_2] : memref<24x16xf32, #tpu.memory_space<vmem>>, vector<16x16xf32>
    %c16 = arith.constant 16 : index
    %c0_3 = arith.constant 0 : index
    %2 = vector.load %arg2[%c16, %c0_3] : memref<24x16xf32, #tpu.memory_space<vmem>>, vector<2x16xf32>
    %c18 = arith.constant 18 : index
    %c0_4 = arith.constant 0 : index
    %3 = vector.load %arg2[%c18, %c0_4] : memref<24x16xf32, #tpu.memory_space<vmem>>, vector<2x16xf32>
    %c23 = arith.constant 23 : index
    %c0_5 = arith.constant 0 : index
    %4 = vector.load %arg2[%c23, %c0_5] : memref<24x16xf32, #tpu.memory_space<vmem>>, vector<1x16xf32>
    %cst = arith.constant dense<0.000000e+00> : vector<64x16xf32>
    %5 = tpu.matmul %0, %1, %cst {dimension_numbers = #tpu.dot_dimension_numbers<[1], [0], [0], [1], [0, 0, 1, 1], [], []>} : vector<64x16xf32>, vector<16x16xf32>, vector<64x16xf32> -> vector<64x16xf32>
    %cst_6 = arith.constant dense<0.000000e+00> : vector<2x64xf32>
    %6 = tpu.matmul %2, %5, %cst_6 {dimension_numbers = #tpu.dot_dimension_numbers<[1], [1], [0], [0], [0, 0, 1, 0], [], []>} : vector<2x16xf32>, vector<64x16xf32>, vector<2x64xf32> -> vector<2x64xf32>
    %cst_7 = arith.constant dense<0.000000e+00> : vector<64x2xf32>
    %7 = tpu.matmul %5, %3, %cst_7 {dimension_numbers = #tpu.dot_dimension_numbers<[1], [1], [0], [0], [0, 0, 1, 0], [], []>} : vector<64x16xf32>, vector<2x16xf32>, vector<64x2xf32> -> vector<64x2xf32>
    %8 = vector.extract_strided_slice %6 {offsets = [0, 0], sizes = [1, 64], strides = [1, 1]} : vector<2x64xf32> to vector<1x64xf32>
    %9 = vector.extract_strided_slice %6 {offsets = [1, 0], sizes = [1, 64], strides = [1, 1]} : vector<2x64xf32> to vector<1x64xf32>
    %10 = tpu.concatenate %8, %9 in 1 : vector<1x64xf32>, vector<1x64xf32> -> vector<1x128xf32>
    %11 = vector.extract_strided_slice %7 {offsets = [0, 0], sizes = [64, 1], strides = [1, 1]} : vector<64x2xf32> to vector<64x1xf32>
    %12 = vector.shape_cast %11 : vector<64x1xf32> to vector<64x1xf32>
    %13 = vector.broadcast %12 : vector<64x1xf32> to vector<64x64xf32>
    %14 = vector.extract_strided_slice %7 {offsets = [0, 1], sizes = [64, 1], strides = [1, 1]} : vector<64x2xf32> to vector<64x1xf32>
    %15 = vector.shape_cast %14 : vector<64x1xf32> to vector<64x1xf32>
    %16 = vector.broadcast %15 : vector<64x1xf32> to vector<64x64xf32>
    %17 = tpu.concatenate %13, %16 in 1 : vector<64x64xf32>, vector<64x64xf32> -> vector<64x128xf32>
    %18 = vector.broadcast %10 : vector<1x128xf32> to vector<64x128xf32>
    %19 = arith.addf %17, %18 : vector<64x128xf32>
    %cst_8 = arith.constant 2.000000e-01 : f32
    %20 = vector.broadcast %cst_8 : f32 to vector<64x128xf32>
    %21 = arith.mulf %20, %19 : vector<64x128xf32>
    %22 = arith.maximumf %19, %21 : vector<64x128xf32>
    %c0_9 = arith.constant 0 : index
    %c0_10 = arith.constant 0 : index
    %23 = vector.load %arg1[%c0_9, %c0_10] : memref<64x128xf32, #tpu.memory_space<vmem>>, vector<64x128xf32>
    %24 = arith.addf %22, %23 : vector<64x128xf32>
    %c20 = arith.constant 20 : index
    %c0_11 = arith.constant 0 : index
    %25 = vector.load %arg2[%c20, %c0_11] : memref<24x16xf32, #tpu.memory_space<vmem>>, vector<2x16xf32>
    %26 = vector.extract_strided_slice %24 {offsets = [0, 0], sizes = [64, 64], strides = [1, 1]} : vector<64x128xf32> to vector<64x64xf32>
    %cst_12 = arith.constant dense<0xFF800000> : vector<64xf32>
    %27 = vector.multi_reduction <maximumf>, %26, %cst_12 [1] : vector<64x64xf32> to vector<64xf32>
    %28 = vector.shape_cast %27 : vector<64xf32> to vector<64x1xf32>
    %29 = vector.shape_cast %28 : vector<64x1xf32> to vector<64x1xf32>
    %30 = vector.broadcast %29 : vector<64x1xf32> to vector<64x64xf32>
    %31 = vector.extract_strided_slice %24 {offsets = [0, 64], sizes = [64, 64], strides = [1, 1]} : vector<64x128xf32> to vector<64x64xf32>
    %cst_13 = arith.constant dense<0xFF800000> : vector<64xf32>
    %32 = vector.multi_reduction <maximumf>, %31, %cst_13 [1] : vector<64x64xf32> to vector<64xf32>
    %33 = vector.shape_cast %32 : vector<64xf32> to vector<64x1xf32>
    %34 = vector.shape_cast %33 : vector<64x1xf32> to vector<64x1xf32>
    %35 = vector.broadcast %34 : vector<64x1xf32> to vector<64x64xf32>
    %36 = tpu.concatenate %30, %35 in 1 : vector<64x64xf32>, vector<64x64xf32> -> vector<64x128xf32>
    %37 = arith.subf %24, %36 : vector<64x128xf32>
    %38 = math.exp %37 : vector<64x128xf32>
    %39 = vector.extract_strided_slice %38 {offsets = [0, 0], sizes = [64, 64], strides = [1, 1]} : vector<64x128xf32> to vector<64x64xf32>
    %cst_14 = arith.constant dense<0.000000e+00> : vector<64xf32>
    %40 = vector.multi_reduction <add>, %39, %cst_14 [1] : vector<64x64xf32> to vector<64xf32>
    %41 = vector.shape_cast %40 : vector<64xf32> to vector<64x1xf32>
    %42 = vector.extract_strided_slice %25 {offsets = [0, 0], sizes = [1, 16], strides = [1, 1]} : vector<2x16xf32> to vector<1x16xf32>
    %cst_15 = arith.constant 1.000000e+00 : f32
    %43 = vector.broadcast %cst_15 : f32 to vector<64x1xf32>
    %44 = arith.divf %43, %41 : vector<64x1xf32>
    %45 = vector.broadcast %42 : vector<1x16xf32> to vector<64x16xf32>
    %46 = vector.broadcast %44 : vector<64x1xf32> to vector<64x16xf32>
    %47 = arith.mulf %45, %46 : vector<64x16xf32>
    %48 = vector.extract_strided_slice %38 {offsets = [0, 64], sizes = [64, 64], strides = [1, 1]} : vector<64x128xf32> to vector<64x64xf32>
    %cst_16 = arith.constant dense<0.000000e+00> : vector<64xf32>
    %49 = vector.multi_reduction <add>, %48, %cst_16 [1] : vector<64x64xf32> to vector<64xf32>
    %50 = vector.shape_cast %49 : vector<64xf32> to vector<64x1xf32>
    %51 = vector.extract_strided_slice %25 {offsets = [1, 0], sizes = [1, 16], strides = [1, 1]} : vector<2x16xf32> to vector<1x16xf32>
    %cst_17 = arith.constant 1.000000e+00 : f32
    %52 = vector.broadcast %cst_17 : f32 to vector<64x1xf32>
    %53 = arith.divf %52, %50 : vector<64x1xf32>
    %54 = vector.broadcast %51 : vector<1x16xf32> to vector<64x16xf32>
    %55 = vector.broadcast %53 : vector<64x1xf32> to vector<64x16xf32>
    %56 = arith.mulf %54, %55 : vector<64x16xf32>
    %57 = arith.addf %47, %56 : vector<64x16xf32>
    %58 = vector.extract_strided_slice %25 {offsets = [0, 0], sizes = [1, 16], strides = [1, 1]} : vector<2x16xf32> to vector<1x16xf32>
    %59 = vector.broadcast %58 : vector<1x16xf32> to vector<64x16xf32>
    %60 = arith.mulf %5, %59 : vector<64x16xf32>
    %61 = vector.extract_strided_slice %25 {offsets = [1, 0], sizes = [1, 16], strides = [1, 1]} : vector<2x16xf32> to vector<1x16xf32>
    %62 = vector.broadcast %61 : vector<1x16xf32> to vector<64x16xf32>
    %63 = arith.mulf %5, %62 : vector<64x16xf32>
    %64 = tpu.concatenate %60, %63 in 0 : vector<64x16xf32>, vector<64x16xf32> -> vector<128x16xf32>
    %cst_18 = arith.constant dense<0.000000e+00> : vector<64x16xf32>
    %65 = tpu.matmul %38, %64, %cst_18 {dimension_numbers = #tpu.dot_dimension_numbers<[1], [0], [0], [1], [0, 0, 1, 1], [], []>} : vector<64x128xf32>, vector<128x16xf32>, vector<64x16xf32> -> vector<64x16xf32>
    %66 = arith.mulf %65, %57 : vector<64x16xf32>
    %c22 = arith.constant 22 : index
    %c0_19 = arith.constant 0 : index
    %67 = vector.load %arg2[%c22, %c0_19] : memref<24x16xf32, #tpu.memory_space<vmem>>, vector<1x16xf32>
    %68 = vector.broadcast %67 : vector<1x16xf32> to vector<64x16xf32>
    %69 = arith.mulf %66, %68 : vector<64x16xf32>
    %70 = vector.broadcast %4 : vector<1x16xf32> to vector<64x16xf32>
    %71 = arith.addf %69, %70 : vector<64x16xf32>
    %cst_20 = arith.constant 0.000000e+00 : f32
    %72 = vector.broadcast %cst_20 : f32 to vector<64x16xf32>
    %73 = arith.maximumf %71, %72 : vector<64x16xf32>
    %c0_21 = arith.constant 0 : index
    %c0_22 = arith.constant 0 : index
    %74 = vector.load %arg3[%c0_21, %c0_22] : memref<24x16xf32, #tpu.memory_space<vmem>>, vector<16x16xf32>
    %c16_23 = arith.constant 16 : index
    %c0_24 = arith.constant 0 : index
    %75 = vector.load %arg3[%c16_23, %c0_24] : memref<24x16xf32, #tpu.memory_space<vmem>>, vector<2x16xf32>
    %c18_25 = arith.constant 18 : index
    %c0_26 = arith.constant 0 : index
    %76 = vector.load %arg3[%c18_25, %c0_26] : memref<24x16xf32, #tpu.memory_space<vmem>>, vector<2x16xf32>
    %c23_27 = arith.constant 23 : index
    %c0_28 = arith.constant 0 : index
    %77 = vector.load %arg3[%c23_27, %c0_28] : memref<24x16xf32, #tpu.memory_space<vmem>>, vector<1x16xf32>
    %cst_29 = arith.constant dense<0.000000e+00> : vector<64x16xf32>
    %78 = tpu.matmul %73, %74, %cst_29 {dimension_numbers = #tpu.dot_dimension_numbers<[1], [0], [0], [1], [0, 0, 1, 1], [], []>} : vector<64x16xf32>, vector<16x16xf32>, vector<64x16xf32> -> vector<64x16xf32>
    %cst_30 = arith.constant dense<0.000000e+00> : vector<2x64xf32>
    %79 = tpu.matmul %75, %78, %cst_30 {dimension_numbers = #tpu.dot_dimension_numbers<[1], [1], [0], [0], [0, 0, 1, 0], [], []>} : vector<2x16xf32>, vector<64x16xf32>, vector<2x64xf32> -> vector<2x64xf32>
    %cst_31 = arith.constant dense<0.000000e+00> : vector<64x2xf32>
    %80 = tpu.matmul %78, %76, %cst_31 {dimension_numbers = #tpu.dot_dimension_numbers<[1], [1], [0], [0], [0, 0, 1, 0], [], []>} : vector<64x16xf32>, vector<2x16xf32>, vector<64x2xf32> -> vector<64x2xf32>
    %81 = vector.extract_strided_slice %79 {offsets = [0, 0], sizes = [1, 64], strides = [1, 1]} : vector<2x64xf32> to vector<1x64xf32>
    %82 = vector.extract_strided_slice %79 {offsets = [1, 0], sizes = [1, 64], strides = [1, 1]} : vector<2x64xf32> to vector<1x64xf32>
    %83 = tpu.concatenate %81, %82 in 1 : vector<1x64xf32>, vector<1x64xf32> -> vector<1x128xf32>
    %84 = vector.extract_strided_slice %80 {offsets = [0, 0], sizes = [64, 1], strides = [1, 1]} : vector<64x2xf32> to vector<64x1xf32>
    %85 = vector.shape_cast %84 : vector<64x1xf32> to vector<64x1xf32>
    %86 = vector.broadcast %85 : vector<64x1xf32> to vector<64x64xf32>
    %87 = vector.extract_strided_slice %80 {offsets = [0, 1], sizes = [64, 1], strides = [1, 1]} : vector<64x2xf32> to vector<64x1xf32>
    %88 = vector.shape_cast %87 : vector<64x1xf32> to vector<64x1xf32>
    %89 = vector.broadcast %88 : vector<64x1xf32> to vector<64x64xf32>
    %90 = tpu.concatenate %86, %89 in 1 : vector<64x64xf32>, vector<64x64xf32> -> vector<64x128xf32>
    %91 = vector.broadcast %83 : vector<1x128xf32> to vector<64x128xf32>
    %92 = arith.addf %90, %91 : vector<64x128xf32>
    %cst_32 = arith.constant 2.000000e-01 : f32
    %93 = vector.broadcast %cst_32 : f32 to vector<64x128xf32>
    %94 = arith.mulf %93, %92 : vector<64x128xf32>
    %95 = arith.maximumf %92, %94 : vector<64x128xf32>
    %c0_33 = arith.constant 0 : index
    %c0_34 = arith.constant 0 : index
    %96 = vector.load %arg1[%c0_33, %c0_34] : memref<64x128xf32, #tpu.memory_space<vmem>>, vector<64x128xf32>
    %97 = arith.addf %95, %96 : vector<64x128xf32>
    %c20_35 = arith.constant 20 : index
    %c0_36 = arith.constant 0 : index
    %98 = vector.load %arg3[%c20_35, %c0_36] : memref<24x16xf32, #tpu.memory_space<vmem>>, vector<2x16xf32>
    %99 = vector.extract_strided_slice %97 {offsets = [0, 0], sizes = [64, 64], strides = [1, 1]} : vector<64x128xf32> to vector<64x64xf32>
    %cst_37 = arith.constant dense<0xFF800000> : vector<64xf32>
    %100 = vector.multi_reduction <maximumf>, %99, %cst_37 [1] : vector<64x64xf32> to vector<64xf32>
    %101 = vector.shape_cast %100 : vector<64xf32> to vector<64x1xf32>
    %102 = vector.shape_cast %101 : vector<64x1xf32> to vector<64x1xf32>
    %103 = vector.broadcast %102 : vector<64x1xf32> to vector<64x64xf32>
    %104 = vector.extract_strided_slice %97 {offsets = [0, 64], sizes = [64, 64], strides = [1, 1]} : vector<64x128xf32> to vector<64x64xf32>
    %cst_38 = arith.constant dense<0xFF800000> : vector<64xf32>
    %105 = vector.multi_reduction <maximumf>, %104, %cst_38 [1] : vector<64x64xf32> to vector<64xf32>
    %106 = vector.shape_cast %105 : vector<64xf32> to vector<64x1xf32>
    %107 = vector.shape_cast %106 : vector<64x1xf32> to vector<64x1xf32>
    %108 = vector.broadcast %107 : vector<64x1xf32> to vector<64x64xf32>
    %109 = tpu.concatenate %103, %108 in 1 : vector<64x64xf32>, vector<64x64xf32> -> vector<64x128xf32>
    %110 = arith.subf %97, %109 : vector<64x128xf32>
    %111 = math.exp %110 : vector<64x128xf32>
    %112 = vector.extract_strided_slice %111 {offsets = [0, 0], sizes = [64, 64], strides = [1, 1]} : vector<64x128xf32> to vector<64x64xf32>
    %cst_39 = arith.constant dense<0.000000e+00> : vector<64xf32>
    %113 = vector.multi_reduction <add>, %112, %cst_39 [1] : vector<64x64xf32> to vector<64xf32>
    %114 = vector.shape_cast %113 : vector<64xf32> to vector<64x1xf32>
    %115 = vector.extract_strided_slice %98 {offsets = [0, 0], sizes = [1, 16], strides = [1, 1]} : vector<2x16xf32> to vector<1x16xf32>
    %cst_40 = arith.constant 1.000000e+00 : f32
    %116 = vector.broadcast %cst_40 : f32 to vector<64x1xf32>
    %117 = arith.divf %116, %114 : vector<64x1xf32>
    %118 = vector.broadcast %115 : vector<1x16xf32> to vector<64x16xf32>
    %119 = vector.broadcast %117 : vector<64x1xf32> to vector<64x16xf32>
    %120 = arith.mulf %118, %119 : vector<64x16xf32>
    %121 = vector.extract_strided_slice %111 {offsets = [0, 64], sizes = [64, 64], strides = [1, 1]} : vector<64x128xf32> to vector<64x64xf32>
    %cst_41 = arith.constant dense<0.000000e+00> : vector<64xf32>
    %122 = vector.multi_reduction <add>, %121, %cst_41 [1] : vector<64x64xf32> to vector<64xf32>
    %123 = vector.shape_cast %122 : vector<64xf32> to vector<64x1xf32>
    %124 = vector.extract_strided_slice %98 {offsets = [1, 0], sizes = [1, 16], strides = [1, 1]} : vector<2x16xf32> to vector<1x16xf32>
    %cst_42 = arith.constant 1.000000e+00 : f32
    %125 = vector.broadcast %cst_42 : f32 to vector<64x1xf32>
    %126 = arith.divf %125, %123 : vector<64x1xf32>
    %127 = vector.broadcast %124 : vector<1x16xf32> to vector<64x16xf32>
    %128 = vector.broadcast %126 : vector<64x1xf32> to vector<64x16xf32>
    %129 = arith.mulf %127, %128 : vector<64x16xf32>
    %130 = arith.addf %120, %129 : vector<64x16xf32>
    %131 = vector.extract_strided_slice %98 {offsets = [0, 0], sizes = [1, 16], strides = [1, 1]} : vector<2x16xf32> to vector<1x16xf32>
    %132 = vector.broadcast %131 : vector<1x16xf32> to vector<64x16xf32>
    %133 = arith.mulf %78, %132 : vector<64x16xf32>
    %134 = vector.extract_strided_slice %98 {offsets = [1, 0], sizes = [1, 16], strides = [1, 1]} : vector<2x16xf32> to vector<1x16xf32>
    %135 = vector.broadcast %134 : vector<1x16xf32> to vector<64x16xf32>
    %136 = arith.mulf %78, %135 : vector<64x16xf32>
    %137 = tpu.concatenate %133, %136 in 0 : vector<64x16xf32>, vector<64x16xf32> -> vector<128x16xf32>
    %cst_43 = arith.constant dense<0.000000e+00> : vector<64x16xf32>
    %138 = tpu.matmul %111, %137, %cst_43 {dimension_numbers = #tpu.dot_dimension_numbers<[1], [0], [0], [1], [0, 0, 1, 1], [], []>} : vector<64x128xf32>, vector<128x16xf32>, vector<64x16xf32> -> vector<64x16xf32>
    %139 = arith.mulf %138, %130 : vector<64x16xf32>
    %c22_44 = arith.constant 22 : index
    %c0_45 = arith.constant 0 : index
    %140 = vector.load %arg3[%c22_44, %c0_45] : memref<24x16xf32, #tpu.memory_space<vmem>>, vector<1x16xf32>
    %141 = vector.broadcast %140 : vector<1x16xf32> to vector<64x16xf32>
    %142 = arith.mulf %139, %141 : vector<64x16xf32>
    %143 = vector.broadcast %77 : vector<1x16xf32> to vector<64x16xf32>
    %144 = arith.addf %142, %143 : vector<64x16xf32>
    %cst_46 = arith.constant 0.000000e+00 : f32
    %145 = vector.broadcast %cst_46 : f32 to vector<64x16xf32>
    %146 = arith.maximumf %144, %145 : vector<64x16xf32>
    %c0_47 = arith.constant 0 : index
    %c0_48 = arith.constant 0 : index
    %147 = vector.load %arg4[%c0_47, %c0_48] : memref<21x4xf32, #tpu.memory_space<vmem>>, vector<16x4xf32>
    %c16_49 = arith.constant 16 : index
    %c0_50 = arith.constant 0 : index
    %148 = vector.load %arg4[%c16_49, %c0_50] : memref<21x4xf32, #tpu.memory_space<vmem>>, vector<1x4xf32>
    %c17 = arith.constant 17 : index
    %c0_51 = arith.constant 0 : index
    %149 = vector.load %arg4[%c17, %c0_51] : memref<21x4xf32, #tpu.memory_space<vmem>>, vector<1x4xf32>
    %c20_52 = arith.constant 20 : index
    %c0_53 = arith.constant 0 : index
    %150 = vector.load %arg4[%c20_52, %c0_53] : memref<21x4xf32, #tpu.memory_space<vmem>>, vector<1x4xf32>
    %cst_54 = arith.constant dense<0.000000e+00> : vector<64x4xf32>
    %151 = tpu.matmul %146, %147, %cst_54 {dimension_numbers = #tpu.dot_dimension_numbers<[1], [0], [0], [1], [0, 0, 1, 1], [], []>} : vector<64x16xf32>, vector<16x4xf32>, vector<64x4xf32> -> vector<64x4xf32>
    %cst_55 = arith.constant dense<0.000000e+00> : vector<1x64xf32>
    %152 = tpu.matmul %148, %151, %cst_55 {dimension_numbers = #tpu.dot_dimension_numbers<[1], [1], [0], [0], [0, 0, 1, 0], [], []>} : vector<1x4xf32>, vector<64x4xf32>, vector<1x64xf32> -> vector<1x64xf32>
    %cst_56 = arith.constant dense<0.000000e+00> : vector<64x1xf32>
    %153 = tpu.matmul %151, %149, %cst_56 {dimension_numbers = #tpu.dot_dimension_numbers<[1], [1], [0], [0], [0, 0, 1, 0], [], []>} : vector<64x4xf32>, vector<1x4xf32>, vector<64x1xf32> -> vector<64x1xf32>
    %154 = vector.broadcast %153 : vector<64x1xf32> to vector<64x64xf32>
    %155 = vector.broadcast %152 : vector<1x64xf32> to vector<64x64xf32>
    %156 = arith.addf %154, %155 : vector<64x64xf32>
    %cst_57 = arith.constant 2.000000e-01 : f32
    %157 = vector.broadcast %cst_57 : f32 to vector<64x64xf32>
    %158 = arith.mulf %157, %156 : vector<64x64xf32>
    %159 = arith.maximumf %156, %158 : vector<64x64xf32>
    %c0_58 = arith.constant 0 : index
    %c0_59 = arith.constant 0 : index
    %160 = vector.load %arg1[%c0_58, %c0_59] : memref<64x128xf32, #tpu.memory_space<vmem>>, vector<64x64xf32>
    %161 = arith.addf %159, %160 : vector<64x64xf32>
    %cst_60 = arith.constant dense<0xFF800000> : vector<64xf32>
    %162 = vector.multi_reduction <maximumf>, %161, %cst_60 [1] : vector<64x64xf32> to vector<64xf32>
    %163 = vector.shape_cast %162 : vector<64xf32> to vector<64x1xf32>
    %164 = vector.broadcast %163 : vector<64x1xf32> to vector<64x64xf32>
    %165 = arith.subf %161, %164 : vector<64x64xf32>
    %166 = math.exp %165 : vector<64x64xf32>
    %cst_61 = arith.constant dense<0.000000e+00> : vector<64xf32>
    %167 = vector.multi_reduction <add>, %166, %cst_61 [1] : vector<64x64xf32> to vector<64xf32>
    %168 = vector.shape_cast %167 : vector<64xf32> to vector<64x1xf32>
    %cst_62 = arith.constant dense<0.000000e+00> : vector<64x4xf32>
    %169 = tpu.matmul %166, %151, %cst_62 {dimension_numbers = #tpu.dot_dimension_numbers<[1], [0], [0], [1], [0, 0, 1, 1], [], []>} : vector<64x64xf32>, vector<64x4xf32>, vector<64x4xf32> -> vector<64x4xf32>
    %cst_63 = arith.constant 1.000000e+00 : f32
    %170 = vector.broadcast %cst_63 : f32 to vector<64x1xf32>
    %171 = arith.divf %170, %168 : vector<64x1xf32>
    %172 = vector.broadcast %171 : vector<64x1xf32> to vector<64x4xf32>
    %173 = arith.mulf %169, %172 : vector<64x4xf32>
    %174 = vector.broadcast %150 : vector<1x4xf32> to vector<64x4xf32>
    %175 = arith.addf %173, %174 : vector<64x4xf32>
    %c0_64 = arith.constant 0 : index
    %c0_65 = arith.constant 0 : index
    %176 = vector.load %arg5[%c0_64, %c0_65] : memref<64x4xf32, #tpu.memory_space<vmem>>, vector<64x4xf32>
    tpu.vector_store %arg5[%c0_64, %c0_65], %175 {strides = array<i32>} : memref<64x4xf32, #tpu.memory_space<vmem>>, vector<64x4xf32>,
    return
  }
}

</mosaic_0001>

<bundles_post_ra>
// kernel: tpu_custom_call.1
= control target key start
LH: loop header
LB: loop body
LE: loop exit
PB: predicated region body
PF: predicated region fallthrough
CT: control target
= control target key end

     0   :  { %vm33_vm0 = vcmask 130048   ;;  %v3058_v12 = vmov 0.0|0.0   ;;  %vm3059_vm1 = vmmov 0   ;;  %v3060_v13 = vmov 0.0   ;;  %s3063_s18 = smov 64   ;;  %s3805_s2 = inlined_call_operand.vmem [shape: f32[24,16], index: 2, kind: input, shape index: {}]   ;;  %s3806_s0 = inlined_call_operand.vmem [shape: f32[64,16], index: 0, kind: input, shape index: {}]   ;;  %s3807_s1 = inlined_call_operand.vmem [shape: f32[64,128], index: 1, kind: input, shape index: {}]   ;;  %s3808_s3 = inlined_call_operand.vmem [shape: f32[24,16], index: 3, kind: input, shape index: {}]   ;;  %s3809_s4 = inlined_call_operand.vmem [shape: f32[21,4], index: 4, kind: input, shape index: {}]   ;;  %s3810_s5 = inlined_call_operand.vmem [shape: f32[64,4], index: 5, kind: output, shape index: {}]  }
   0x1   :  { %v28_v0 = vld [vmem:[%s3805_s2] sm:$0xff]  ;;  %v29_v1 = vld [vmem:[%s3805_s2 + $0x8] sm:$0xff]  ;;  %v31_v4 = vld [vmem:[%s3805_s2 + $0x12] sm:$0x3]  ;;  %v3061_v14 = vmov 0   ;;  %v455_v15 = vlaneseq  ;;  %v3062_v62 = vmov 1  }
   0x2   :  { %v2759_v2 = vpack.c.bf16 %v29_v1, %v28_v0  ;;  %v20_v3 = vld [vmem:[%s3806_s0] sm:$0xff]  ;;  %v21_v5 = vld [vmem:[%s3806_s0 + $0x8] sm:$0xff]  ;;  %2545 = vmatprep.subr.msk.mxu0 %vm33_vm0, %v31_v4  ;;  %v22_v6 = vld [vmem:[%s3806_s0 + $0x10] sm:$0xff]  ;;  %2905 = vset.pattern.permute.xlu1 %v3061_v14  ;;  %vm373_vm3 = vcmask 523264   ;;  %vm524_vm4 = vcmask 1048064   ;;  %vm1869_vm5 = vcmask 31744  }
   0x3   :  { %2514 = vmatprep.mubr.msk.f32.mxu1 %vm33_vm0, %v20_v3  ;;  %2546 = vmatpush3.xpose.msk.msra.mxu0 %vm33_vm0, %v31_v4  ;;  %v23_v7 = vld [vmem:[%s3806_s0 + $0x18] sm:$0xff]  ;;  %v24_v8 = vld [vmem:[%s3806_s0 + $0x20] sm:$0xff]  ;;  %v25_v9 = vld [vmem:[%s3806_s0 + $0x28] sm:$0xff]  ;;  %v3142_v16 = vshrl.u32 %v455_v15, 7 }
   0x4   :  { %2760 = vmatprep.subr.bf16.mxu1 %v2759_v2  ;;  %v26_v10 = vld [vmem:[%s3806_s0 + $0x30] sm:$0xff]  ;;  %v27_v11 = vld [vmem:[%s3806_s0 + $0x38] sm:$0xff]  ;;  %2907 = vset.pattern.permute.xlu0 %v3061_v14  ;;  %vm3162_vm2 = vmpackc.low %vm33_vm0, %vm33_vm0 }
   0x5   :  { %2762 = vmatpush3.bf16.msra.mxu1 %v2759_v2  ;;  %v3145_v17 = vsub.s32 0, %v3142_v16  ;;  %v707_v18 = vsub.s32 1, %v3142_v16  ;;  %v499_v19 = vld [vmem:[%s3805_s2 + $0x14] sm:$0x3]  ;;  %v30_v59 = vld [vmem:[%s3805_s2 + $0x10] sm:$0x3]  ;;  %vm3694_vm6 = vmpackc.low %vm1869_vm5, %vm1869_vm5 }
   0x6   :  { %2763 = vmatprep.subr.bf16.mxu1 %v3058_v12 }
   0x7   :  { %v3152_v20 = vrot.slane %v499_v19, %v3145_v17  ;;  %v3156_v21 = vrot.slane %v499_v19, %v707_v18 }
   0x8   :  { %2515 = vmatmul.mubr.msk.f32.vlgmr.msra.gmra.mrb[0].mxu1 %vm33_vm0, %v21_v5 }
   0x9   :  { %2517 = vmatprep.mubr.msk.f32.mxu1 %vm33_vm0, %v22_v6 }
   0xc   :  { %2518 = vmatmul.mubr.msk.f32.gmra.mrb[2].mxu1 %vm33_vm0, %v23_v7 }
   0xd   :  { %2520 = vmatprep.mubr.msk.f32.mxu1 %vm33_vm0, %v24_v8 }
  0x10   :  { %2521 = vmatmul.mubr.msk.f32.gmra.mrb[4].mxu1 %vm33_vm0, %v25_v9 }
  0x11   :  { %2523 = vmatprep.mubr.msk.f32.mxu1 %vm33_vm0, %v26_v10 }
  0x14   :  { %2524 = vmatmul.mubr.msk.f32.gmra.mrb[6].mxu1 %vm33_vm0, %v27_v11 }
  0x15   :  { %2542 = vmatprep.mubr.msk.f32.mxu1 %vm3059_vm1, %v3060_v13 }
  0xdb   :  { %v2516_v22 = vpop.f32.mrb[0].mxu1 }
  0xdc   :  { %v726_v23 = vmul.f32 %v2516_v22, %v3152_v20  ;;  %v734_v24 = vmul.f32 %v2516_v22, %v3156_v21  ;;  %v124_v25 = vpop.f32.mrb[1].mxu1 }
  0xdd   :  { %v2764_v27 = vpack.c.bf16 %v2516_v22, %v124_v25  ;;  %v725_v28 = vmul.f32 %v3152_v20, %v124_v25  ;;  %v733_v29 = vmul.f32 %v3156_v21, %v124_v25  ;;  %2547 = vmatprep.mubr.msk.f32.mxu0 %vm33_vm0, %v124_v25 }
  0xde   :  { %2548 = vmatmul.mubr.msk.f32.vlgmr.msra.gmra.mrb[0].mxu0 %vm33_vm0, %v2516_v22 }
  0xdf   :  { %v2519_v30 = vpop.f32.mrb[2].mxu1  ;;  %2766 = vmatpush3.bf16.xpose.msk.msra.mxu1 %vm3162_vm2, %v2764_v27  ;;  %v2779_v31 = vpack.c.bf16 %v726_v23, %v725_v28  ;;  %v2795_v32 = vpack.c.bf16 %v734_v24, %v733_v29 }
  0xe0   :  { %v728_v33 = vmul.f32 %v2519_v30, %v3152_v20  ;;  %v736_v34 = vmul.f32 %v2519_v30, %v3156_v21  ;;  %v134_v35 = vpop.f32.mrb[3].mxu1  ;;  %2767 = vmatprep.subr.bf16.mxu1 %v3058_v12 }
  0xe1   :  { %v2768_v36 = vpack.c.bf16 %v2519_v30, %v134_v35  ;;  %v727_v37 = vmul.f32 %v3152_v20, %v134_v35  ;;  %v735_v38 = vmul.f32 %v3156_v21, %v134_v35  ;;  %2780 = vmatprep.subr.bf16.mxu0 %v2779_v31  ;;  %2550 = vmatprep.mubr.msk.f32.mxu0 %vm33_vm0, %v134_v35 }
  0xe2   :  { %2782 = vmatpush3.bf16.msra.mxu0 %v2779_v31 }
  0xe3   :  { %v2522_v39 = vpop.f32.mrb[4].mxu1  ;;  %2551 = vmatmul.mubr.msk.f32.gmra.mrb[2].mxu0 %vm33_vm0, %v2519_v30  ;;  %v2783_v40 = vpack.c.bf16 %v728_v33, %v727_v37  ;;  %v2799_v41 = vpack.c.bf16 %v736_v34, %v735_v38 }
  0xe4   :  { %v730_v42 = vmul.f32 %v2522_v39, %v3152_v20  ;;  %v738_v43 = vmul.f32 %v2522_v39, %v3156_v21  ;;  %v144_v44 = vpop.f32.mrb[5].mxu1 }
  0xe5   :  { %v2772_v45 = vpack.c.bf16 %v2522_v39, %v144_v44  ;;  %v729_v46 = vmul.f32 %v3152_v20, %v144_v44  ;;  %v737_v47 = vmul.f32 %v3156_v21, %v144_v44  ;;  %2784 = vmatprep.subr.bf16.mxu0 %v2783_v40  ;;  %2553 = vmatprep.mubr.msk.f32.mxu0 %vm33_vm0, %v144_v44 }
  0xe6   :  { %2786 = vmatpush3.bf16.msra.mxu0 %v2783_v40  ;;  %v3232_v40 = vld [vmem:[%s3807_s1] sm:$0xff] }
  0xe7   :  { %v2525_v48 = vpop.f32.mrb[6].mxu1  ;;  %2770 = vmatpush3.bf16.xpose.msk.msra.mxu1 %vm3162_vm2, %v2768_v36  ;;  %v2787_v49 = vpack.c.bf16 %v730_v42, %v729_v46  ;;  %2554 = vmatmul.mubr.msk.f32.gmra.mrb[4].mxu0 %vm33_vm0, %v2522_v39  ;;  %v2803_v50 = vpack.c.bf16 %v738_v43, %v737_v47  ;;  %v3242_v46 = vld [vmem:[%s3807_s1 + $0x8] sm:$0xff] }
  0xe8   :  { %v732_v51 = vmul.f32 %v2525_v48, %v3152_v20  ;;  %v740_v52 = vmul.f32 %v2525_v48, %v3156_v21  ;;  %v154_v53 = vpop.f32.mrb[7].mxu1  ;;  %2771 = vmatprep.subr.bf16.mxu1 %v3058_v12 }
  0xe9   :  { %v2776_v54 = vpack.c.bf16 %v2525_v48, %v154_v53  ;;  %v731_v55 = vmul.f32 %v3152_v20, %v154_v53  ;;  %v739_v56 = vmul.f32 %v3156_v21, %v154_v53  ;;  %2788 = vmatprep.subr.bf16.mxu0 %v2787_v49  ;;  %2556 = vmatprep.mubr.msk.f32.mxu0 %vm33_vm0, %v154_v53  ;;  %v3260_v53 = vld [vmem:[%s3807_s1 + $0x18] sm:$0xff] }
  0xea   :  { %2790 = vmatpush3.bf16.msra.mxu0 %v2787_v49 }
  0xeb   :  { %v2791_v57 = vpack.c.bf16 %v732_v51, %v731_v55  ;;  %2557 = vmatmul.mubr.msk.f32.gmra.mrb[6].mxu0 %vm33_vm0, %v2525_v48  ;;  %v2807_v58 = vpack.c.bf16 %v740_v52, %v739_v56 }
  0xed   :  { %2792 = vmatprep.subr.bf16.mxu0 %v2791_v57 }
  0xee   :  { %2794 = vmatpush3.bf16.msra.mxu0 %v2791_v57 }
  0xef   :  { %2774 = vmatpush3.bf16.xpose.msk.msra.mxu1 %vm3162_vm2, %v2772_v45  ;;  %2796 = vmatprep.subr.bf16.mxu0 %v2795_v32  ;;  %v3237_v45 = vld [vmem:[%s3807_s1 + $0x10] sm:$0xff] }
  0xf0   :  { %2775 = vmatprep.subr.bf16.mxu1 %v3058_v12 }
  0xf2   :  { %2798 = vmatpush3.bf16.msra.mxu0 %v2795_v32 }
  0xf3   :  { %2800 = vmatprep.subr.bf16.mxu0 %v2799_v41 }
  0xf6   :  { %2802 = vmatpush3.bf16.msra.mxu0 %v2799_v41 }
  0xf7   :  { %2778 = vmatpush3.bf16.xpose.msk.msra.mxu1 %vm3162_vm2, %v2776_v54  ;;  %2804 = vmatprep.subr.bf16.mxu0 %v2803_v50 }
  0xfa   :  { %2806 = vmatpush3.bf16.msra.mxu0 %v2803_v50 }
  0xfb   :  { %2808 = vmatprep.subr.bf16.mxu0 %v2807_v58 }
  0xfe   :  { %2543 = vmatmul.mubr.msk.f32.vlgmr.msra.gmra.mrb[8].mxu1 %vm33_vm0, %v30_v59  ;;  %2810 = vmatpush3.bf16.msra.mxu0 %v2807_v58 }
 0x1b1   :  { %v2549_v60 = vpop.f32.mrb[0].mxu0 }
 0x1b2   :  { %382 = vperm.xlu1 %2905, %v2549_v60   ;;  %v329_v61 = vpop.f32.mrb[1].mxu0 }
 0x1b3   :  { %377 = vperm.xlu0 %2907, %v329_v61  }
 0x1b6   :  { %2906 = vset.pattern.permute.xlu1 %v3062_v62  ;;  %v2552_v63 = vpop.f32.mrb[2].mxu0 }
 0x1b7   :  { %420 = vperm.xlu1 %2906, %v2549_v60   ;;  %2908 = vset.pattern.permute.xlu0 %v3062_v62  ;;  %v339_v0 = vpop.f32.mrb[3].mxu0 }
 0x1b8   :  { %416 = vperm.xlu0 %2908, %v329_v61  }
 0x1ba   :  { %v2555_v1 = vpop.f32.mrb[4].mxu0 }
 0x1bb   :  { %2909 = vset.pattern.permute.xlu1 %v3061_v14  ;;  %v349_v2 = vpop.f32.mrb[5].mxu0 }
 0x1bc   :  { %2910 = vset.pattern.permute.xlu0 %v3061_v14  ;;  %392 = vperm.xlu1 %2909, %v2552_v63  }
 0x1bd   :  { %387 = vperm.xlu0 %2910, %v339_v0  }
 0x1be   :  { %v2558_v3 = vpop.f32.mrb[6].mxu0 }
 0x1bf   :  { %v359_v4 = vpop.f32.mrb[7].mxu0 }
 0x1c0   :  { %2912 = vset.pattern.permute.xlu1 %v3062_v62 }
 0x1c1   :  { %424 = vperm.xlu1 %2912, %v339_v0   ;;  %2911 = vset.pattern.permute.xlu0 %v3062_v62 }
 0x1c2   :  { %428 = vperm.xlu0 %2911, %v2552_v63  }
 0x1c5   :  { %2913 = vset.pattern.permute.xlu1 %v3061_v14 }
 0x1c6   :  { %2915 = vset.pattern.permute.xlu0 %v3061_v14  ;;  %397 = vperm.xlu1 %2913, %v349_v2  }
 0x1c7   :  { %402 = vperm.xlu0 %2915, %v2555_v1  }
 0x1ca   :  { %2914 = vset.pattern.permute.xlu1 %v3062_v62 }
 0x1cb   :  { %2917 = vset.pattern.permute.xlu0 %v3062_v62 }
 0x1cc   :  { %440 = vperm.xlu0 %2917, %v359_v4  }
 0x1d1   :  { %v256_v5 = vpop.f32.mrb[8].mxu1 }
 0x1d2   :  { %v369_v6 = vrot.slane %v256_v5, 1  ;;  %v2544_v7 = vpop.f32.mrb[9].mxu1 }
 0x1d4   :  { %370 = vrot.lane.b32.xlu1 %v369_v6, %s3063_s18 }
 0x1d8   :  { %432 = vperm.xlu1 %2914, %v349_v2  }
 0x1dc   :  { %436 = vperm.xlu1 %2914, %v2555_v1   ;;  %v3275_v1 = vld [vmem:[%s3807_s1 + $0x20] sm:$0xff] }
 0x1e0   :  { %2916 = vset.pattern.permute.xlu1 %v3061_v14 }
 0x1e1   :  { %407 = vperm.xlu1 %2916, %v359_v4  }
 0x1e5   :  { %412 = vperm.xlu1 %2916, %v2558_v3  }
 0x1e9   :  { %2918 = vset.pattern.permute.xlu1 %v3062_v62 }
 0x1ea   :  { %444 = vperm.xlu1 %2918, %v2558_v3  }
 0x1ee   :  { %2919 = vset.pattern.permute.xlu1 %v3061_v14 }
 0x231   :  { %v383_v8 = vpop.permute.xlu1 %382 }
 0x232   :  { %v378_v10 = vpop.permute.xlu0 %377 }
 0x236   :  { %v421_v9 = vpop.permute.xlu1 %420 }
 0x237   :  { %v417_v15 = vpop.permute.xlu0 %416  ;;  %v448_v29 = vsel %vm373_vm3, %v383_v8, %v421_v9 }
 0x238   :  { %v447_v30 = vsel %vm373_vm3, %v378_v10, %v417_v15  ;;  %v3288_v10 = vld [vmem:[%s3807_s1 + $0x28] sm:$0xff] }
 0x23b   :  { %v393_v11 = vpop.permute.xlu1 %392 }
 0x23c   :  { %v388_v22 = vpop.permute.xlu0 %387 }
 0x240   :  { %v425_v19 = vpop.permute.xlu1 %424 }
 0x241   :  { %v429_v24 = vpop.permute.xlu0 %428  ;;  %v449_v31 = vsel %vm373_vm3, %v388_v22, %v425_v19 }
 0x242   :  { %v450_v32 = vsel %vm373_vm3, %v393_v11, %v429_v24 }
 0x245   :  { %v398_v23 = vpop.permute.xlu1 %397 }
 0x246   :  { %v403_v60 = vpop.permute.xlu0 %402 }
 0x249   :  { %v371_v25 = vpop.permute.xlu1 %370 }
 0x24a   :  { %v374_v27 = vsel %vm373_vm3, %v256_v5, %v371_v25 }
 0x24b   :  { %v3219_v28 = vrot.slane %v374_v27, %v3145_v17  ;;  %v441_v8 = vpop.permute.xlu0 %440 }
 0x24d   :  { %v459_v33 = vadd.f32 %v3219_v28, %v447_v30  ;;  %v461_v34 = vadd.f32 %v3219_v28, %v449_v31  ;;  %v460_v35 = vadd.f32 %v3219_v28, %v448_v29  ;;  %v462_v36 = vadd.f32 %v3219_v28, %v450_v32  ;;  %v3306_v31 = vld [vmem:[%s3807_s1 + $0x30] sm:$0xff] }
 0x24f   :  { %v467_v37 = vmul.f32 0.2, %v459_v33  ;;  %v469_v38 = vmul.f32 0.2, %v461_v34  ;;  %v468_v39 = vmul.f32 0.2, %v460_v35 }
 0x250   :  { %v470_v41 = vmul.f32 0.2, %v462_v36 }
 0x251   :  { %v475_v42 = vmax.f32 %v459_v33, %v467_v37  ;;  %v477_v43 = vmax.f32 %v461_v34, %v469_v38  ;;  %v476_v44 = vmax.f32 %v460_v35, %v468_v39 }
 0x252   :  { %v478_v48 = vmax.f32 %v462_v36, %v470_v41 }
 0x253   :  { %v3245_v47 = vadd.f32 %v3232_v40, %v475_v42  ;;  %v3252_v51 = vadd.f32 %v3237_v45, %v477_v43  ;;  %v3255_v52 = vadd.f32 %v3242_v46, %v476_v44  ;;  %v3322_v42 = vld [vmem:[%s3807_s1 + $0x38] sm:$0xff] }
 0x254   :  { %v3269_v59 = vadd.f32 %v3260_v53, %v478_v48 }
 0x255   :  { %v525_v49 = vsel %vm524_vm4, %v3245_v47, -inf  ;;  %v500_v50 = vsel %vm373_vm3, %v3245_v47, -inf  ;;  %v506_v57 = vsel %vm373_vm3, %v3252_v51, -inf  ;;  %v503_v58 = vsel %vm373_vm3, %v3255_v52, -inf }
 0x256   :  { %526 = vmax.xlane.f32.xlu1 %v525_v49  ;;  %501 = vmax.xlane.f32.xlu0 %v500_v50  ;;  %v509_v4 = vsel %vm373_vm3, %v3269_v59, -inf  ;;  %v528_v5 = vsel %vm524_vm4, %v3255_v52, -inf  ;;  %v531_v19 = vsel %vm524_vm4, %v3252_v51, -inf  ;;  %v534_v29 = vsel %vm524_vm4, %v3269_v59, -inf }
 0x257   :  { %v433_v54 = vpop.permute.xlu1 %432 }
 0x258   :  { %v451_v55 = vsel %vm373_vm3, %v398_v23, %v433_v54 }
 0x259   :  { %v463_v56 = vadd.f32 %v3219_v28, %v451_v55 }
 0x25a   :  { %507 = vmax.xlane.f32.xlu1 %v506_v57  ;;  %504 = vmax.xlane.f32.xlu0 %v503_v58 }
 0x25b   :  { %v471_v61 = vmul.f32 0.2, %v463_v56  ;;  %v437_v63 = vpop.permute.xlu1 %436 }
 0x25c   :  { %v452_v0 = vsel %vm373_vm3, %v403_v60, %v437_v63 }
 0x25d   :  { %v479_v2 = vmax.f32 %v463_v56, %v471_v61  ;;  %v464_v3 = vadd.f32 %v3219_v28, %v452_v0 }
 0x25e   :  { %510 = vmax.xlane.f32.xlu1 %v509_v4  ;;  %529 = vmax.xlane.f32.xlu0 %v528_v5 }
 0x25f   :  { %v472_v6 = vmul.f32 0.2, %v464_v3  ;;  %v3283_v7 = vadd.f32 %v3275_v1, %v479_v2 }
 0x260   :  { %v408_v9 = vpop.permute.xlu1 %407 }
 0x261   :  { %v480_v11 = vmax.f32 %v464_v3, %v472_v6  ;;  %v453_v15 = vsel %vm373_vm3, %v408_v9, %v441_v8  ;;  %v512_v22 = vsel %vm373_vm3, %v3283_v7, -inf  ;;  %v537_v35 = vsel %vm524_vm4, %v3283_v7, -inf }
 0x262   :  { %v465_v23 = vadd.f32 %v3219_v28, %v453_v15  ;;  %532 = vmax.xlane.f32.xlu0 %v531_v19  ;;  %513 = vmax.xlane.f32.xlu1 %v512_v22 }
 0x263   :  { %v3297_v24 = vadd.f32 %v3288_v10, %v480_v11 }
 0x264   :  { %v473_v25 = vmul.f32 0.2, %v465_v23  ;;  %v413_v27 = vpop.permute.xlu1 %412 }
 0x265   :  { %v515_v30 = vsel %vm373_vm3, %v3297_v24, -inf  ;;  %v540_v41 = vsel %vm524_vm4, %v3297_v24, -inf }
 0x266   :  { %v481_v32 = vmax.f32 %v465_v23, %v473_v25  ;;  %535 = vmax.xlane.f32.xlu0 %v534_v29  ;;  %516 = vmax.xlane.f32.xlu1 %v515_v30 }
 0x268   :  { %v3309_v33 = vadd.f32 %v3306_v31, %v481_v32 }
 0x269   :  { %v445_v34 = vpop.permute.xlu1 %444 }
 0x26a   :  { %v454_v36 = vsel %vm373_vm3, %v413_v27, %v445_v34  ;;  %538 = vmax.xlane.f32.xlu0 %v537_v35  ;;  %v518_v37 = vsel %vm373_vm3, %v3309_v33, -inf  ;;  %v543_v44 = vsel %vm524_vm4, %v3309_v33, -inf }
 0x26b   :  { %v466_v38 = vadd.f32 %v3219_v28, %v454_v36  ;;  %519 = vmax.xlane.f32.xlu1 %v518_v37 }
 0x26d   :  { %v474_v39 = vmul.f32 0.2, %v466_v38 }
 0x26e   :  { %541 = vmax.xlane.f32.xlu0 %v540_v41 }
 0x26f   :  { %v482_v43 = vmax.f32 %v466_v38, %v474_v39 }
 0x271   :  { %v3327_v48 = vadd.f32 %v3322_v42, %v482_v43 }
 0x272   :  { %544 = vmax.xlane.f32.xlu0 %v543_v44 }
 0x273   :  { %v521_v28 = vsel %vm373_vm3, %v3327_v48, -inf  ;;  %v546_v49 = vsel %vm524_vm4, %v3327_v48, -inf }
 0x274   :  { %522 = vmax.xlane.f32.xlu1 %v521_v28 }
 0x276   :  { %547 = vmax.xlane.f32.xlu0 %v546_v49 }
 0x2e3   :  { %v502_v50 = vpop.xlane.xlu0 %501  ;;  %v527_v54 = vpop.xlane.xlu1 %526 }
 0x2e4   :  { %v549_v55 = vsel %vm373_vm3, %v502_v50, %v527_v54 }
 0x2e5   :  { %v557_v56 = vsub.f32 %v3245_v47, %v549_v55 }
 0x2e7   :  { %v565_v57 = vmul.f32 1.442695, %v557_v56  ;;  %v505_v58 = vpop.xlane.xlu0 %504  ;;  %v508_v60 = vpop.xlane.xlu1 %507 }
 0x2e9   :  { %2922 = vpow2.f32 %v565_v57 }
 0x2eb   :  { %v530_v61 = vpop.xlane.xlu0 %529  ;;  %v511_v2 = vpop.xlane.xlu1 %510 }
 0x2ec   :  { %v550_v63 = vsel %vm373_vm3, %v505_v58, %v530_v61 }
 0x2ed   :  { %v558_v0 = vsub.f32 %v3255_v52, %v550_v63 }
 0x2ef   :  { %v567_v3 = vmul.f32 1.442695, %v558_v0  ;;  %v533_v4 = vpop.xlane.xlu0 %532  ;;  %v514_v47 = vpop.xlane.xlu1 %513 }
 0x2f0   :  { %v551_v5 = vsel %vm373_vm3, %v508_v60, %v533_v4 }
 0x2f1   :  { %2924 = vpow2.f32 %v567_v3  ;;  %v559_v6 = vsub.f32 %v3252_v51, %v551_v5 }
 0x2f3   :  { %v2923_v8 = vpop.eup %2922  ;;  %v569_v9 = vmul.f32 1.442695, %v559_v6  ;;  %v536_v11 = vpop.xlane.xlu0 %535 }
 0x2f4   :  { %v552_v15 = vsel %vm373_vm3, %v511_v2, %v536_v11  ;;  %641 = vrot.lane.b32.xlu1 %v2923_v8, %s3063_s18  ;;  %2591 = vmatprep.mubr.f32.mxu0 %v2923_v8  ;;  %v517_v25 = vpop.xlane.xlu1 %516 }
 0x2f5   :  { %2926 = vpow2.f32 %v569_v9  ;;  %v560_v52 = vsub.f32 %v3269_v59, %v552_v15 }
 0x2f7   :  { %v571_v19 = vmul.f32 1.442695, %v560_v52  ;;  %v539_v22 = vpop.xlane.xlu0 %538 }
 0x2f8   :  { %v553_v23 = vsel %vm373_vm3, %v514_v47, %v539_v22  ;;  %v520_v35 = vpop.xlane.xlu1 %519 }
 0x2f9   :  { %2928 = vpow2.f32 %v571_v19  ;;  %v561_v51 = vsub.f32 %v3283_v7, %v553_v23 }
 0x2fb   :  { %v2925_v27 = vpop.eup %2924  ;;  %v573_v29 = vmul.f32 1.442695, %v561_v51  ;;  %v542_v30 = vpop.xlane.xlu0 %541 }
 0x2fc   :  { %v554_v32 = vsel %vm373_vm3, %v517_v25, %v542_v30  ;;  %643 = vrot.lane.b32.xlu0 %v2925_v27, %s3063_s18  ;;  %2592 = vmatmul.mubr.f32.vlgmr.msra.gmra.mrb[8].mxu0 %v2925_v27  ;;  %v584_v56 = vsel %vm373_vm3, %v2925_v27, 0.0  ;;  %v887_v27 = vld [vmem:[%s3808_s3] sm:$0xff] }
 0x2fd   :  { %2930 = vpow2.f32 %v573_v29  ;;  %v562_v34 = vsub.f32 %v3297_v24, %v554_v32  ;;  %v888_v29 = vld [vmem:[%s3808_s3 + $0x8] sm:$0xff]  ;;  %v890_v32 = vld [vmem:[%s3808_s3 + $0x12] sm:$0x3] }
 0x2fe   :  { %v2811_v30 = vpack.c.bf16 %v888_v29, %v887_v27  ;;  %2638 = vmatprep.subr.msk.mxu0 %vm33_vm0, %v890_v32 }
 0x2ff   :  { %v2927_v59 = vpop.eup %2926  ;;  %v575_v36 = vmul.f32 1.442695, %v562_v34  ;;  %v545_v37 = vpop.xlane.xlu0 %544  ;;  %2639 = vmatpush3.xpose.msk.msra.mxu0 %vm33_vm0, %v890_v32 }
 0x300   :  { %v555_v38 = vsel %vm373_vm3, %v520_v35, %v545_v37  ;;  %645 = vrot.lane.b32.xlu1 %v2927_v59, %s3063_s18  ;;  %2594 = vmatprep.mubr.f32.mxu0 %v2927_v59  ;;  %v587_v60 = vsel %vm373_vm3, %v2927_v59, 0.0 }
 0x301   :  { %2932 = vpow2.f32 %v575_v36  ;;  %v563_v7 = vsub.f32 %v3309_v33, %v555_v38  ;;  %v523_v43 = vpop.xlane.xlu1 %522  ;;  %2812 = vmatprep.subr.bf16.mxu1 %v2811_v30 }
 0x302   :  { %2814 = vmatpush3.bf16.msra.mxu1 %v2811_v30 }
 0x303   :  { %v2929_v39 = vpop.eup %2928  ;;  %v577_v41 = vmul.f32 1.442695, %v563_v7  ;;  %v548_v44 = vpop.xlane.xlu0 %547  ;;  %2815 = vmatprep.subr.bf16.mxu1 %v3058_v12 }
 0x304   :  { %v556_v28 = vsel %vm373_vm3, %v523_v43, %v548_v44  ;;  %647 = vrot.lane.b32.xlu1 %v2929_v39, %s3063_s18  ;;  %2595 = vmatmul.mubr.f32.gmra.mrb[10].mxu0 %v2929_v39  ;;  %v590_v0 = vsel %vm373_vm3, %v2929_v39, 0.0 }
 0x305   :  { %2934 = vpow2.f32 %v577_v41  ;;  %v564_v24 = vsub.f32 %v3327_v48, %v556_v28  ;;  %v581_v48 = vsel %vm373_vm3, %v2923_v8, 0.0 }
 0x307   :  { %v2931_v49 = vpop.eup %2930  ;;  %v579_v50 = vmul.f32 1.442695, %v564_v24 }
 0x308   :  { %649 = vrot.lane.b32.xlu0 %v2931_v49, %s3063_s18  ;;  %2597 = vmatprep.mubr.f32.mxu0 %v2931_v49  ;;  %v593_v3 = vsel %vm373_vm3, %v2931_v49, 0.0 }
 0x309   :  { %2936 = vpow2.f32 %v579_v50 }
 0x30b   :  { %v2933_v54 = vpop.eup %2932 }
 0x30c   :  { %651 = vrot.lane.b32.xlu1 %v2933_v54, %s3063_s18  ;;  %2598 = vmatmul.mubr.f32.gmra.mrb[12].mxu0 %v2933_v54  ;;  %v596_v6 = vsel %vm373_vm3, %v2933_v54, 0.0 }
 0x30f   :  { %v2935_v33 = vpop.eup %2934 }
 0x310   :  { %653 = vrot.lane.b32.xlu0 %v2935_v33, %s3063_s18  ;;  %2600 = vmatprep.mubr.f32.mxu0 %v2935_v33  ;;  %v599_v47 = vsel %vm373_vm3, %v2935_v33, 0.0 }
 0x313   :  { %v2937_v55 = vpop.eup %2936 }
 0x314   :  { %655 = vrot.lane.b32.xlu1 %v2937_v55, %s3063_s18  ;;  %2601 = vmatmul.mubr.f32.gmra.mrb[14].mxu0 %v2937_v55  ;;  %v602_v52 = vsel %vm373_vm3, %v2937_v55, 0.0 }
 0x32f   :  { %582 = vadd.xlane.f32.xlu0 %v581_v48 }
 0x333   :  { %585 = vadd.xlane.f32.xlu0 %v584_v56 }
 0x366   :  { %v642_v57 = vpop.permute.xlu1 %641 }
 0x367   :  { %v665_v58 = vsel %vm373_vm3, %v642_v57, 0.0 }
 0x368   :  { %666 = vadd.xlane.f32.xlu1 %v665_v58  ;;  %v3400_v58 = vld [vmem:[%s3805_s2 + $0x16] ss:$0 sm:$0xff] }
 0x36c   :  { %588 = vadd.xlane.f32.xlu1 %v587_v60 }
 0x36e   :  { %v644_v61 = vpop.permute.xlu0 %643 }
 0x36f   :  { %v668_v63 = vsel %vm373_vm3, %v644_v61, 0.0 }
 0x370   :  { %669 = vadd.xlane.f32.xlu0 %v668_v63  ;;  %591 = vadd.xlane.f32.xlu1 %v590_v0 }
 0x372   :  { %v646_v2 = vpop.permute.xlu1 %645 }
 0x373   :  { %v671_v4 = vsel %vm373_vm3, %v646_v2, 0.0  ;;  %v3405_v2 = vld [vmem:[%s3805_s2 + $0x17] ss:$0 sm:$0xff] }
 0x374   :  { %594 = vadd.xlane.f32.xlu1 %v593_v3  ;;  %672 = vadd.xlane.f32.xlu0 %v671_v4 }
 0x376   :  { %v648_v5 = vpop.permute.xlu1 %647 }
 0x377   :  { %v674_v8 = vsel %vm373_vm3, %v648_v5, 0.0 }
 0x378   :  { %597 = vadd.xlane.f32.xlu1 %v596_v6  ;;  %675 = vadd.xlane.f32.xlu0 %v674_v8 }
 0x37a   :  { %v650_v9 = vpop.permute.xlu0 %649 }
 0x37b   :  { %v677_v11 = vsel %vm373_vm3, %v650_v9, 0.0 }
 0x37c   :  { %600 = vadd.xlane.f32.xlu1 %v599_v47  ;;  %678 = vadd.xlane.f32.xlu0 %v677_v11 }
 0x37e   :  { %v652_v15 = vpop.permute.xlu1 %651 }
 0x37f   :  { %v680_v19 = vsel %vm373_vm3, %v652_v15, 0.0 }
 0x380   :  { %603 = vadd.xlane.f32.xlu1 %v602_v52  ;;  %681 = vadd.xlane.f32.xlu0 %v680_v19 }
 0x382   :  { %v654_v22 = vpop.permute.xlu0 %653 }
 0x383   :  { %v683_v23 = vsel %vm373_vm3, %v654_v22, 0.0 }
 0x384   :  { %684 = vadd.xlane.f32.xlu0 %v683_v23 }
 0x386   :  { %v656_v25 = vpop.permute.xlu1 %655 }
 0x387   :  { %v686_v51 = vsel %vm373_vm3, %v656_v25, 0.0 }
 0x388   :  { %687 = vadd.xlane.f32.xlu0 %v686_v51 }
 0x3bc   :  { %v583_v41 = vpop.xlane.xlu0 %582 }
 0x3bd   :  { %2938 = vrcp.f32 %v583_v41 }
 0x3c0   :  { %v586_v44 = vpop.xlane.xlu0 %585 }
 0x3c7   :  { %v2939_v50 = vpop.eup %2938 }
 0x3c8   :  { %v625_v33 = vmul.f32 %v2939_v50, %v3152_v20 }
 0x3cf   :  { %v2593_v34 = vpop.f32.mrb[8].mxu0 }
 0x3d0   :  { %v807_v59 = vpop.f32.mrb[9].mxu0 }
 0x3d7   :  { %v3385_v35 = vpop.f32.mrb[10].mxu0 }
 0x3d8   :  { %v817_v36 = vpop.f32.mrb[11].mxu0 }
 0x3df   :  { %v3387_v37 = vpop.f32.mrb[12].mxu0 }
 0x3e0   :  { %v3389_v38 = vpop.f32.mrb[13].mxu0 }
 0x3e7   :  { %v3391_v7 = vpop.f32.mrb[14].mxu0 }
 0x3e8   :  { %v3393_v39 = vpop.f32.mrb[15].mxu0 }
 0x3f5   :  { %v667_v43 = vpop.xlane.xlu1 %666 }
 0x3f6   :  { %2940 = vrcp.f32 %v667_v43 }
 0x3f7   :  { %2942 = vrcp.f32 %v586_v44 }
 0x3f9   :  { %v589_v28 = vpop.xlane.xlu1 %588 }
 0x3fd   :  { %v670_v24 = vpop.xlane.xlu0 %669  ;;  %v592_v49 = vpop.xlane.xlu1 %591 }
 0x3fe   :  { %2944 = vrcp.f32 %v670_v24 }
 0x3ff   :  { %2946 = vrcp.f32 %v589_v28 }
 0x400   :  { %v2941_v54 = vpop.eup %2940 }
 0x401   :  { %v709_v55 = vmul.f32 %v2941_v54, %v3156_v21  ;;  %v673_v48 = vpop.xlane.xlu0 %672  ;;  %v595_v56 = vpop.xlane.xlu1 %594 }
 0x402   :  { %2948 = vrcp.f32 %v673_v48  ;;  %v2943_v0 = vpop.eup %2942 }
 0x403   :  { %v717_v57 = vadd.f32 %v709_v55, %v625_v33  ;;  %2950 = vrcp.f32 %v592_v49  ;;  %v626_v5 = vmul.f32 %v2943_v0, %v3152_v20 }
 0x405   :  { %v676_v60 = vpop.xlane.xlu0 %675  ;;  %v598_v61 = vpop.xlane.xlu1 %597  ;;  %v846_v63 = vmul.f32 %v807_v59, %v717_v57 }
 0x406   :  { %2952 = vrcp.f32 %v676_v60 }
 0x407   :  { %v859_v3 = vmul.f32 %v3400_v58, %v846_v63  ;;  %2954 = vrcp.f32 %v595_v56 }
 0x408   :  { %v2945_v4 = vpop.eup %2944 }
 0x409   :  { %v710_v6 = vmul.f32 %v2945_v4, %v3156_v21  ;;  %v679_v8 = vpop.xlane.xlu0 %678  ;;  %v871_v9 = vadd.f32 %v3405_v2, %v859_v3  ;;  %v2947_v47 = vpop.eup %2946 }
 0x40a   :  { %2956 = vrcp.f32 %v679_v8  ;;  %v601_v15 = vpop.xlane.xlu1 %600  ;;  %v627_v22 = vmul.f32 %v2947_v47, %v3152_v20 }
 0x40b   :  { %v718_v11 = vadd.f32 %v710_v6, %v626_v5  ;;  %v879_v52 = vmax.f32 %v871_v9, 0.0  ;;  %2958 = vrcp.f32 %v598_v61 }
 0x40c   :  { %v2949_v19 = vpop.eup %2948 }
 0x40d   :  { %v847_v23 = vmul.f32 %v2593_v34, %v718_v11  ;;  %v711_v25 = vmul.f32 %v2949_v19, %v3156_v21  ;;  %v682_v51 = vpop.xlane.xlu0 %681  ;;  %2607 = vmatprep.mubr.msk.f32.mxu1 %vm33_vm0, %v879_v52  ;;  %v2951_v27 = vpop.eup %2950 }
 0x40e   :  { %2960 = vrcp.f32 %v682_v51  ;;  %v628_v59 = vmul.f32 %v2951_v27, %v3152_v20  ;;  %v604_v43 = vpop.xlane.xlu1 %603 }
 0x40f   :  { %v719_v29 = vadd.f32 %v711_v25, %v627_v22  ;;  %v860_v30 = vmul.f32 %v3400_v58, %v847_v23  ;;  %2962 = vrcp.f32 %v601_v15 }
 0x410   :  { %v2953_v32 = vpop.eup %2952 }
 0x411   :  { %v712_v41 = vmul.f32 %v2953_v32, %v3156_v21  ;;  %v685_v44 = vpop.xlane.xlu0 %684  ;;  %v872_v34 = vadd.f32 %v3405_v2, %v860_v30  ;;  %v848_v28 = vmul.f32 %v817_v36, %v719_v29  ;;  %v2955_v24 = vpop.eup %2954 }
 0x412   :  { %2964 = vrcp.f32 %v685_v44  ;;  %v629_v55 = vmul.f32 %v2955_v24, %v3152_v20 }
 0x413   :  { %v720_v49 = vadd.f32 %v712_v41, %v628_v59  ;;  %v880_v50 = vmax.f32 %v872_v34, 0.0  ;;  %v861_v54 = vmul.f32 %v3400_v58, %v848_v28  ;;  %2966 = vrcp.f32 %v604_v43 }
 0x414   :  { %v2957_v33 = vpop.eup %2956 }
 0x415   :  { %v713_v48 = vmul.f32 %v2957_v33, %v3156_v21  ;;  %v688_v56 = vpop.xlane.xlu0 %687  ;;  %2608 = vmatmul.mubr.msk.f32.vlgmr.msra.gmra.mrb[10].mxu1 %vm33_vm0, %v880_v50  ;;  %v873_v57 = vadd.f32 %v3405_v2, %v861_v54  ;;  %v849_v60 = vmul.f32 %v3385_v35, %v720_v49  ;;  %v2959_v36 = vpop.eup %2958 }
 0x416   :  { %2968 = vrcp.f32 %v688_v56  ;;  %v630_v4 = vmul.f32 %v2959_v36, %v3152_v20 }
 0x417   :  { %v721_v61 = vadd.f32 %v713_v48, %v629_v55  ;;  %v881_v63 = vmax.f32 %v873_v57, 0.0  ;;  %v862_v0 = vmul.f32 %v3400_v58, %v849_v60 }
 0x418   :  { %v2961_v3 = vpop.eup %2960 }
 0x419   :  { %v714_v5 = vmul.f32 %v2961_v3, %v3156_v21  ;;  %2610 = vmatprep.mubr.msk.f32.mxu1 %vm33_vm0, %v881_v63  ;;  %v874_v6 = vadd.f32 %v3405_v2, %v862_v0  ;;  %v850_v8 = vmul.f32 %v3389_v38, %v721_v61  ;;  %v2963_v9 = vpop.eup %2962 }
 0x41a   :  { %v631_v52 = vmul.f32 %v2963_v9, %v3152_v20 }
 0x41b   :  { %v722_v47 = vadd.f32 %v714_v5, %v630_v4  ;;  %v882_v35 = vmax.f32 %v874_v6, 0.0  ;;  %v863_v11 = vmul.f32 %v3400_v58, %v850_v8 }
 0x41c   :  { %v2965_v15 = vpop.eup %2964 }
 0x41d   :  { %v715_v19 = vmul.f32 %v2965_v15, %v3156_v21  ;;  %2611 = vmatmul.mubr.msk.f32.gmra.mrb[12].mxu1 %vm33_vm0, %v882_v35  ;;  %v875_v22 = vadd.f32 %v3405_v2, %v863_v11  ;;  %v851_v23 = vmul.f32 %v3387_v37, %v722_v47  ;;  %v2967_v25 = vpop.eup %2966 }
 0x41e   :  { %v632_v30 = vmul.f32 %v2967_v25, %v3152_v20 }
 0x41f   :  { %v723_v51 = vadd.f32 %v715_v19, %v631_v52  ;;  %v883_v27 = vmax.f32 %v875_v22, 0.0  ;;  %v864_v38 = vmul.f32 %v3400_v58, %v851_v23 }
 0x420   :  { %v2969_v29 = vpop.eup %2968 }
 0x421   :  { %v716_v32 = vmul.f32 %v2969_v29, %v3156_v21  ;;  %2613 = vmatprep.mubr.msk.f32.mxu1 %vm33_vm0, %v883_v27  ;;  %v876_v59 = vadd.f32 %v3405_v2, %v864_v38  ;;  %v852_v41 = vmul.f32 %v3393_v39, %v723_v51  ;;  %v1348_v39 = vld [vmem:[%s3808_s3 + $0x14] sm:$0x3] }
 0x422   :  { %v3456_v50 = vrot.slane %v1348_v39, %v3145_v17 }
 0x423   :  { %v724_v43 = vadd.f32 %v716_v32, %v632_v30  ;;  %v884_v44 = vmax.f32 %v876_v59, 0.0  ;;  %v865_v37 = vmul.f32 %v3400_v58, %v852_v41  ;;  %v889_v59 = vld [vmem:[%s3808_s3 + $0x10] sm:$0x3] }
 0x425   :  { %2614 = vmatmul.mubr.msk.f32.gmra.mrb[14].mxu1 %vm33_vm0, %v884_v44  ;;  %v877_v34 = vadd.f32 %v3405_v2, %v865_v37  ;;  %v853_v28 = vmul.f32 %v3391_v7, %v724_v43  ;;  %v3460_v7 = vrot.slane %v1348_v39, %v707_v18 }
 0x427   :  { %v885_v24 = vmax.f32 %v877_v34, 0.0  ;;  %v866_v20 = vmul.f32 %v3400_v58, %v853_v28 }
 0x429   :  { %2616 = vmatprep.mubr.msk.f32.mxu1 %vm33_vm0, %v885_v24  ;;  %v878_v21 = vadd.f32 %v3405_v2, %v866_v20 }
 0x42b   :  { %v886_v49 = vmax.f32 %v878_v21, 0.0 }
 0x42d   :  { %2617 = vmatmul.mubr.msk.f32.gmra.mrb[16].mxu1 %vm33_vm0, %v886_v49 }
 0x42e   :  { %2635 = vmatprep.mubr.msk.f32.mxu1 %vm3059_vm1, %v3060_v13 }
 0x4e8   :  { %v2609_v58 = vpop.f32.mrb[10].mxu1 }
 0x4e9   :  { %v1574_v2 = vmul.f32 %v2609_v58, %v3456_v50  ;;  %v1582_v54 = vmul.f32 %v2609_v58, %v3460_v7  ;;  %v982_v33 = vpop.f32.mrb[11].mxu1 }
 0x4ea   :  { %v2816_v55 = vpack.c.bf16 %v2609_v58, %v982_v33  ;;  %v1573_v48 = vmul.f32 %v3456_v50, %v982_v33  ;;  %v1581_v56 = vmul.f32 %v3460_v7, %v982_v33  ;;  %2640 = vmatprep.mubr.msk.f32.mxu0 %vm33_vm0, %v982_v33 }
 0x4eb   :  { %2641 = vmatmul.mubr.msk.f32.vlgmr.msra.gmra.mrb[16].mxu0 %vm33_vm0, %v2609_v58 }
 0x4ec   :  { %2818 = vmatpush3.bf16.xpose.msk.msra.mxu1 %vm3162_vm2, %v2816_v55  ;;  %v2831_v16 = vpack.c.bf16 %v1574_v2, %v1573_v48  ;;  %v2847_v18 = vpack.c.bf16 %v1582_v54, %v1581_v56 }
 0x4ed   :  { %2819 = vmatprep.subr.bf16.mxu1 %v3058_v12 }
 0x4ee   :  { %2832 = vmatprep.subr.bf16.mxu0 %v2831_v16 }
 0x4ef   :  { %2834 = vmatpush3.bf16.msra.mxu0 %v2831_v16 }
 0x4f0   :  { %v2612_v57 = vpop.f32.mrb[12].mxu1 }
 0x4f1   :  { %v1576_v60 = vmul.f32 %v2612_v57, %v3456_v50  ;;  %v1584_v36 = vmul.f32 %v2612_v57, %v3460_v7  ;;  %v992_v61 = vpop.f32.mrb[13].mxu1 }
 0x4f2   :  { %v2820_v63 = vpack.c.bf16 %v2612_v57, %v992_v61  ;;  %v1575_v0 = vmul.f32 %v3456_v50, %v992_v61  ;;  %v1583_v3 = vmul.f32 %v3460_v7, %v992_v61  ;;  %2643 = vmatprep.mubr.msk.f32.mxu0 %vm33_vm0, %v992_v61 }
 0x4f3   :  { %2644 = vmatmul.mubr.msk.f32.gmra.mrb[18].mxu0 %vm33_vm0, %v2612_v57 }
 0x4f4   :  { %2822 = vmatpush3.bf16.xpose.msk.msra.mxu1 %vm3162_vm2, %v2820_v63  ;;  %v2835_v4 = vpack.c.bf16 %v1576_v60, %v1575_v0  ;;  %v2851_v5 = vpack.c.bf16 %v1584_v36, %v1583_v3 }
 0x4f5   :  { %2823 = vmatprep.subr.bf16.mxu1 %v3058_v12 }
 0x4f6   :  { %2836 = vmatprep.subr.bf16.mxu0 %v2835_v4 }
 0x4f7   :  { %2838 = vmatpush3.bf16.msra.mxu0 %v2835_v4 }
 0x4f8   :  { %v2615_v6 = vpop.f32.mrb[14].mxu1 }
 0x4f9   :  { %v1578_v8 = vmul.f32 %v2615_v6, %v3456_v50  ;;  %v1586_v9 = vmul.f32 %v2615_v6, %v3460_v7  ;;  %v1002_v47 = vpop.f32.mrb[15].mxu1 }
 0x4fa   :  { %v2824_v35 = vpack.c.bf16 %v2615_v6, %v1002_v47  ;;  %v1577_v11 = vmul.f32 %v3456_v50, %v1002_v47  ;;  %v1585_v15 = vmul.f32 %v3460_v7, %v1002_v47  ;;  %2646 = vmatprep.mubr.msk.f32.mxu0 %vm33_vm0, %v1002_v47 }
 0x4fb   :  { %2647 = vmatmul.mubr.msk.f32.gmra.mrb[20].mxu0 %vm33_vm0, %v2615_v6 }
 0x4fc   :  { %2826 = vmatpush3.bf16.xpose.msk.msra.mxu1 %vm3162_vm2, %v2824_v35  ;;  %v2839_v52 = vpack.c.bf16 %v1578_v8, %v1577_v11  ;;  %v2855_v19 = vpack.c.bf16 %v1586_v9, %v1585_v15 }
 0x4fd   :  { %2827 = vmatprep.subr.bf16.mxu1 %v3058_v12 }
 0x4fe   :  { %2840 = vmatprep.subr.bf16.mxu0 %v2839_v52 }
 0x4ff   :  { %2842 = vmatpush3.bf16.msra.mxu0 %v2839_v52 }
 0x500   :  { %v2618_v22 = vpop.f32.mrb[16].mxu1 }
 0x501   :  { %v1580_v23 = vmul.f32 %v2618_v22, %v3456_v50  ;;  %v1588_v25 = vmul.f32 %v2618_v22, %v3460_v7  ;;  %v1012_v51 = vpop.f32.mrb[17].mxu1 }
 0x502   :  { %v2828_v27 = vpack.c.bf16 %v2618_v22, %v1012_v51  ;;  %v1579_v38 = vmul.f32 %v3456_v50, %v1012_v51  ;;  %v1587_v29 = vmul.f32 %v3460_v7, %v1012_v51  ;;  %2649 = vmatprep.mubr.msk.f32.mxu0 %vm33_vm0, %v1012_v51 }
 0x503   :  { %2650 = vmatmul.mubr.msk.f32.gmra.mrb[22].mxu0 %vm33_vm0, %v2618_v22 }
 0x504   :  { %2830 = vmatpush3.bf16.xpose.msk.msra.mxu1 %vm3162_vm2, %v2828_v27  ;;  %v2843_v30 = vpack.c.bf16 %v1580_v23, %v1579_v38  ;;  %v2859_v32 = vpack.c.bf16 %v1588_v25, %v1587_v29 }
 0x506   :  { %2844 = vmatprep.subr.bf16.mxu0 %v2843_v30 }
 0x507   :  { %2846 = vmatpush3.bf16.msra.mxu0 %v2843_v30 }
 0x508   :  { %2848 = vmatprep.subr.bf16.mxu0 %v2847_v18 }
 0x50b   :  { %2636 = vmatmul.mubr.msk.f32.vlgmr.msra.gmra.mrb[18].mxu1 %vm33_vm0, %v889_v59  ;;  %2850 = vmatpush3.bf16.msra.mxu0 %v2847_v18 }
 0x50c   :  { %2852 = vmatprep.subr.bf16.mxu0 %v2851_v5 }
 0x50f   :  { %2854 = vmatpush3.bf16.msra.mxu0 %v2851_v5 }
 0x510   :  { %2856 = vmatprep.subr.bf16.mxu0 %v2855_v19 }
 0x513   :  { %2858 = vmatpush3.bf16.msra.mxu0 %v2855_v19 }
 0x514   :  { %2860 = vmatprep.subr.bf16.mxu0 %v2859_v32 }
 0x517   :  { %2862 = vmatpush3.bf16.msra.mxu0 %v2859_v32 }
 0x5be   :  { %v2642_v26 = vpop.f32.mrb[16].mxu0 }
 0x5bf   :  { %1239 = vperm.xlu1 %2919, %v2642_v26   ;;  %v1187_v41 = vpop.f32.mrb[17].mxu0 }
 0x5c0   :  { %1273 = vperm.xlu0 %2917, %v1187_v41  }
 0x5c3   :  { %1234 = vperm.xlu1 %2919, %v1187_v41  }
 0x5c6   :  { %v2645_v43 = vpop.f32.mrb[18].mxu0 }
 0x5c7   :  { %2920 = vset.pattern.permute.xlu1 %v3062_v62  ;;  %v1197_v44 = vpop.f32.mrb[19].mxu0 }
 0x5c8   :  { %1277 = vperm.xlu1 %2920, %v2642_v26   ;;  %1281 = vperm.xlu0 %2917, %v1197_v44  }
 0x5cc   :  { %2921 = vset.pattern.permute.xlu1 %v3061_v14 }
 0x5cd   :  { %1244 = vperm.xlu1 %2921, %v1197_v44  }
 0x5ce   :  { %v2648_v37 = vpop.f32.mrb[20].mxu0 }
 0x5cf   :  { %v1207_v34 = vpop.f32.mrb[21].mxu0 }
 0x5d1   :  { %1249 = vperm.xlu1 %2921, %v2645_v43  }
 0x5d5   :  { %1254 = vperm.xlu1 %2921, %v1207_v34  }
 0x5d6   :  { %v2651_v28 = vpop.f32.mrb[22].mxu0 }
 0x5d7   :  { %v1217_v24 = vpop.f32.mrb[23].mxu0 }
 0x5d9   :  { %1259 = vperm.xlu1 %2921, %v2648_v37  }
 0x5dd   :  { %1264 = vperm.xlu1 %2921, %v1217_v24  }
 0x5de   :  { %v1114_v20 = vpop.f32.mrb[18].mxu1 }
 0x5df   :  { %v1227_v21 = vrot.slane %v1114_v20, 1  ;;  %v2637_v49 = vpop.f32.mrb[19].mxu1 }
 0x5e1   :  { %1269 = vperm.xlu1 %2921, %v2651_v28   ;;  %1228 = vrot.lane.b32.xlu0 %v1227_v21, %s3063_s18 }
 0x5e5   :  { %1285 = vperm.xlu0 %2917, %v2645_v43  }
 0x5e9   :  { %1289 = vperm.xlu0 %2917, %v1207_v34  }
 0x5ed   :  { %1293 = vperm.xlu0 %2917, %v2648_v37  }
 0x5f1   :  { %1297 = vperm.xlu0 %2917, %v1217_v24  }
 0x5f5   :  { %1301 = vperm.xlu0 %2917, %v2651_v28  }
 0x63e   :  { %v1240_v14 = vpop.permute.xlu1 %1239 }
 0x63f   :  { %v1274_v39 = vpop.permute.xlu0 %1273 }
 0x642   :  { %v1235_v62 = vpop.permute.xlu1 %1234 }
 0x643   :  { %v1304_v56 = vsel %vm373_vm3, %v1235_v62, %v1274_v39 }
 0x647   :  { %v1278_v58 = vpop.permute.xlu1 %1277  ;;  %v1282_v2 = vpop.permute.xlu0 %1281 }
 0x648   :  { %v1305_v16 = vsel %vm373_vm3, %v1240_v14, %v1278_v58 }
 0x64c   :  { %v1245_v54 = vpop.permute.xlu1 %1244 }
 0x64d   :  { %v1306_v18 = vsel %vm373_vm3, %v1245_v54, %v1282_v2 }
 0x650   :  { %v1250_v5 = vpop.permute.xlu1 %1249 }
 0x653   :  { %v1229_v33 = vpop.permute.xlu0 %1228 }
 0x654   :  { %v1231_v55 = vsel %vm373_vm3, %v1114_v20, %v1229_v33  ;;  %v1255_v11 = vpop.permute.xlu1 %1254 }
 0x655   :  { %v3506_v48 = vrot.slane %v1231_v55, %v3145_v17 }
 0x657   :  { %v1316_v57 = vadd.f32 %v3506_v48, %v1304_v56  ;;  %v1317_v60 = vadd.f32 %v3506_v48, %v1305_v16  ;;  %v1318_v36 = vadd.f32 %v3506_v48, %v1306_v18 }
 0x658   :  { %v1260_v51 = vpop.permute.xlu1 %1259 }
 0x659   :  { %v1324_v61 = vmul.f32 0.2, %v1316_v57  ;;  %v1325_v63 = vmul.f32 0.2, %v1317_v60  ;;  %v1326_v4 = vmul.f32 0.2, %v1318_v36 }
 0x65b   :  { %v1332_v0 = vmax.f32 %v1316_v57, %v1324_v61  ;;  %v1333_v3 = vmax.f32 %v1317_v60, %v1325_v63  ;;  %v1334_v35 = vmax.f32 %v1318_v36, %v1326_v4 }
 0x65c   :  { %v1265_v43 = vpop.permute.xlu1 %1264 }
 0x65d   :  { %v3515_v6 = vadd.f32 %v1332_v0, %v3232_v40  ;;  %v3522_v47 = vadd.f32 %v1333_v3, %v3242_v46  ;;  %v3529_v52 = vadd.f32 %v1334_v35, %v3237_v45 }
 0x65f   :  { %v1373_v8 = vsel %vm524_vm4, %v3515_v6, -inf  ;;  %v1349_v9 = vsel %vm373_vm3, %v3515_v6, -inf  ;;  %v1352_v15 = vsel %vm373_vm3, %v3522_v47, -inf  ;;  %v1376_v40 = vsel %vm524_vm4, %v3522_v47, -inf }
 0x660   :  { %1374 = vmax.xlane.f32.xlu0 %v1373_v8  ;;  %1350 = vmax.xlane.f32.xlu1 %v1349_v9  ;;  %v1355_v23 = vsel %vm373_vm3, %v3529_v52, -inf  ;;  %v1379_v25 = vsel %vm524_vm4, %v3529_v52, -inf  ;;  %v1270_v58 = vpop.permute.xlu1 %1269 }
 0x664   :  { %1353 = vmax.xlane.f32.xlu0 %v1352_v15  ;;  %1377 = vmax.xlane.f32.xlu1 %v1376_v40  ;;  %v1286_v19 = vpop.permute.xlu0 %1285 }
 0x665   :  { %v1307_v22 = vsel %vm373_vm3, %v1250_v5, %v1286_v19 }
 0x666   :  { %v1319_v46 = vadd.f32 %v3506_v48, %v1307_v22 }
 0x668   :  { %v1327_v27 = vmul.f32 0.2, %v1319_v46  ;;  %1356 = vmax.xlane.f32.xlu0 %v1355_v23  ;;  %1380 = vmax.xlane.f32.xlu1 %v1379_v25  ;;  %v1290_v38 = vpop.permute.xlu0 %1289 }
 0x669   :  { %v1308_v45 = vsel %vm373_vm3, %v1255_v11, %v1290_v38 }
 0x66a   :  { %v1335_v29 = vmax.f32 %v1319_v46, %v1327_v27  ;;  %v1320_v30 = vadd.f32 %v3506_v48, %v1308_v45 }
 0x66c   :  { %v1328_v32 = vmul.f32 0.2, %v1320_v30  ;;  %v1294_v59 = vpop.permute.xlu0 %1293  ;;  %v3540_v26 = vadd.f32 %v1335_v29, %v3260_v53 }
 0x66d   :  { %v1309_v41 = vsel %vm373_vm3, %v1260_v51, %v1294_v59 }
 0x66e   :  { %v1336_v44 = vmax.f32 %v1320_v30, %v1328_v32  ;;  %v1321_v37 = vadd.f32 %v3506_v48, %v1309_v41  ;;  %v1382_v34 = vsel %vm524_vm4, %v3540_v26, -inf  ;;  %v1358_v28 = vsel %vm373_vm3, %v3540_v26, -inf }
 0x66f   :  { %1383 = vmax.xlane.f32.xlu1 %v1382_v34  ;;  %1359 = vmax.xlane.f32.xlu0 %v1358_v28 }
 0x670   :  { %v1329_v24 = vmul.f32 0.2, %v1321_v37  ;;  %v1298_v20 = vpop.permute.xlu0 %1297  ;;  %v3549_v21 = vadd.f32 %v1336_v44, %v3275_v1 }
 0x671   :  { %v1310_v53 = vsel %vm373_vm3, %v1265_v43, %v1298_v20 }
 0x672   :  { %v1337_v49 = vmax.f32 %v1321_v37, %v1329_v24  ;;  %v1322_v14 = vadd.f32 %v3506_v48, %v1310_v53  ;;  %v1385_v62 = vsel %vm524_vm4, %v3549_v21, -inf  ;;  %v1361_v39 = vsel %vm373_vm3, %v3549_v21, -inf }
 0x673   :  { %1386 = vmax.xlane.f32.xlu1 %v1385_v62  ;;  %1362 = vmax.xlane.f32.xlu0 %v1361_v39 }
 0x674   :  { %v1330_v2 = vmul.f32 0.2, %v1322_v14  ;;  %v1302_v54 = vpop.permute.xlu0 %1301  ;;  %v3558_v33 = vadd.f32 %v1337_v49, %v3288_v10 }
 0x675   :  { %v1311_v1 = vsel %vm373_vm3, %v1270_v58, %v1302_v54 }
 0x676   :  { %v1338_v55 = vmax.f32 %v1322_v14, %v1330_v2  ;;  %v1323_v56 = vadd.f32 %v3506_v48, %v1311_v1  ;;  %v1388_v16 = vsel %vm524_vm4, %v3558_v33, -inf  ;;  %v1364_v18 = vsel %vm373_vm3, %v3558_v33, -inf }
 0x677   :  { %1389 = vmax.xlane.f32.xlu1 %v1388_v16  ;;  %1365 = vmax.xlane.f32.xlu0 %v1364_v18 }
 0x678   :  { %v1331_v57 = vmul.f32 0.2, %v1323_v56  ;;  %v1346_v60 = vadd.f32 %v1338_v55, %v3306_v31 }
 0x67a   :  { %v1339_v36 = vmax.f32 %v1323_v56, %v1331_v57  ;;  %v1391_v10 = vsel %vm524_vm4, %v1346_v60, -inf  ;;  %v1367_v61 = vsel %vm373_vm3, %v1346_v60, -inf }
 0x67b   :  { %1392 = vmax.xlane.f32.xlu1 %v1391_v10  ;;  %1368 = vmax.xlane.f32.xlu0 %v1367_v61 }
 0x67c   :  { %v3570_v48 = vadd.f32 %v1339_v36, %v3322_v42 }
 0x67e   :  { %v1394_v63 = vsel %vm524_vm4, %v3570_v48, -inf  ;;  %v1370_v0 = vsel %vm373_vm3, %v3570_v48, -inf }
 0x67f   :  { %1395 = vmax.xlane.f32.xlu1 %v1394_v63  ;;  %1371 = vmax.xlane.f32.xlu0 %v1370_v0 }
 0x6ed   :  { %v1351_v3 = vpop.xlane.xlu1 %1350  ;;  %v1375_v31 = vpop.xlane.xlu0 %1374 }
 0x6ee   :  { %v1397_v4 = vsel %vm373_vm3, %v1351_v3, %v1375_v31 }
 0x6ef   :  { %v1405_v5 = vsub.f32 %v3515_v6, %v1397_v4 }
 0x6f1   :  { %v1413_v8 = vmul.f32 1.442695, %v1405_v5  ;;  %v1378_v9 = vpop.xlane.xlu1 %1377  ;;  %v1354_v35 = vpop.xlane.xlu0 %1353 }
 0x6f2   :  { %v1398_v42 = vsel %vm373_vm3, %v1354_v35, %v1378_v9 }
 0x6f3   :  { %2970 = vpow2.f32 %v1413_v8  ;;  %v1406_v11 = vsub.f32 %v3522_v47, %v1398_v42 }
 0x6f5   :  { %v1415_v15 = vmul.f32 1.442695, %v1406_v11  ;;  %v1381_v40 = vpop.xlane.xlu1 %1380  ;;  %v1357_v19 = vpop.xlane.xlu0 %1356 }
 0x6f6   :  { %v1399_v22 = vsel %vm373_vm3, %v1357_v19, %v1381_v40 }
 0x6f7   :  { %2972 = vpow2.f32 %v1415_v15  ;;  %v1407_v46 = vsub.f32 %v3529_v52, %v1399_v22 }
 0x6f9   :  { %v1417_v23 = vmul.f32 1.442695, %v1407_v46  ;;  %v1735_v46 = vld [vmem:[%s3809_s4] sm:$0xff] }
 0x6fb   :  { %2974 = vpow2.f32 %v1417_v23  ;;  %v1736_v23 = vld [vmem:[%s3809_s4 + $0x8] sm:$0xff] }
 0x6fc   :  { %v1384_v25 = vpop.xlane.xlu1 %1383  ;;  %v1360_v6 = vpop.xlane.xlu0 %1359 }
 0x6fd   :  { %v2971_v51 = vpop.eup %2970  ;;  %v1400_v27 = vsel %vm373_vm3, %v1360_v6, %v1384_v25  ;;  %v2863_v25 = vpack.c.bf16 %v1736_v23, %v1735_v46 }
 0x6fe   :  { %v1408_v38 = vsub.f32 %v3540_v26, %v1400_v27  ;;  %1489 = vrot.lane.b32.xlu0 %v2971_v51, %s3063_s18  ;;  %2684 = vmatprep.mubr.f32.mxu0 %v2971_v51  ;;  %v1429_v56 = vsel %vm373_vm3, %v2971_v51, 0.0 }
 0x6ff   :  { %2864 = vmatprep.subr.bf16.mxu1 %v2863_v25 }
 0x700   :  { %v1419_v47 = vmul.f32 1.442695, %v1408_v38  ;;  %v1387_v45 = vpop.xlane.xlu1 %1386  ;;  %v1363_v29 = vpop.xlane.xlu0 %1362  ;;  %2866 = vmatpush3.bf16.msra.mxu1 %v2863_v25 }
 0x701   :  { %v2973_v30 = vpop.eup %2972  ;;  %v1401_v32 = vsel %vm373_vm3, %v1363_v29, %v1387_v45  ;;  %2867 = vmatprep.subr.bf16.mxu1 %v3058_v12 }
 0x702   :  { %2976 = vpow2.f32 %v1419_v47  ;;  %v1409_v52 = vsub.f32 %v3549_v21, %v1401_v32  ;;  %1491 = vrot.lane.b32.xlu1 %v2973_v30, %s3063_s18  ;;  %2685 = vmatmul.mubr.f32.vlgmr.msra.gmra.mrb[24].mxu0 %v2973_v30  ;;  %v1432_v36 = vsel %vm373_vm3, %v2973_v30, 0.0 }
 0x704   :  { %v1421_v59 = vmul.f32 1.442695, %v1409_v52  ;;  %v1390_v41 = vpop.xlane.xlu1 %1389  ;;  %v1366_v43 = vpop.xlane.xlu0 %1365 }
 0x705   :  { %v2975_v44 = vpop.eup %2974  ;;  %v1402_v26 = vsel %vm373_vm3, %v1366_v43, %v1390_v41 }
 0x706   :  { %2978 = vpow2.f32 %v1421_v59  ;;  %v1410_v37 = vsub.f32 %v3558_v33, %v1402_v26  ;;  %1493 = vrot.lane.b32.xlu1 %v2975_v44, %s3063_s18  ;;  %2687 = vmatprep.mubr.f32.mxu0 %v2975_v44 }
 0x708   :  { %v1423_v34 = vmul.f32 1.442695, %v1410_v37  ;;  %v1393_v28 = vpop.xlane.xlu1 %1392  ;;  %v1369_v24 = vpop.xlane.xlu0 %1368 }
 0x709   :  { %v1403_v20 = vsel %vm373_vm3, %v1369_v24, %v1393_v28 }
 0x70a   :  { %2980 = vpow2.f32 %v1423_v34  ;;  %v1411_v21 = vsub.f32 %v1346_v60, %v1403_v20 }
 0x70c   :  { %v2977_v53 = vpop.eup %2976  ;;  %v1425_v49 = vmul.f32 1.442695, %v1411_v21  ;;  %v1396_v14 = vpop.xlane.xlu1 %1395 }
 0x70d   :  { %v1372_v62 = vpop.xlane.xlu0 %1371  ;;  %1495 = vrot.lane.b32.xlu0 %v2977_v53, %s3063_s18  ;;  %2688 = vmatmul.mubr.f32.gmra.mrb[26].mxu0 %v2977_v53  ;;  %v1438_v63 = vsel %vm373_vm3, %v2977_v53, 0.0 }
 0x70e   :  { %v1404_v39 = vsel %vm373_vm3, %v1372_v62, %v1396_v14  ;;  %2982 = vpow2.f32 %v1425_v49  ;;  %v3637_v49 = vld [vmem:[%s3808_s3 + $0x16] ss:$0 sm:$0xff] }
 0x70f   :  { %v1412_v58 = vsub.f32 %v3570_v48, %v1404_v39  ;;  %v1435_v48 = vsel %vm373_vm3, %v2975_v44, 0.0 }
 0x710   :  { %v2979_v2 = vpop.eup %2978 }
 0x711   :  { %v1427_v54 = vmul.f32 1.442695, %v1412_v58  ;;  %1497 = vrot.lane.b32.xlu1 %v2979_v2, %s3063_s18  ;;  %2690 = vmatprep.mubr.f32.mxu0 %v2979_v2  ;;  %v1441_v31 = vsel %vm373_vm3, %v2979_v2, 0.0 }
 0x713   :  { %2984 = vpow2.f32 %v1427_v54  ;;  %v3644_v54 = vld [vmem:[%s3808_s3 + $0x17] ss:$0 sm:$0xff] }
 0x714   :  { %v2981_v33 = vpop.eup %2980 }
 0x715   :  { %1499 = vrot.lane.b32.xlu0 %v2981_v33, %s3063_s18  ;;  %2691 = vmatmul.mubr.f32.gmra.mrb[28].mxu0 %v2981_v33  ;;  %v1444_v8 = vsel %vm373_vm3, %v2981_v33, 0.0 }
 0x718   :  { %v2983_v1 = vpop.eup %2982 }
 0x719   :  { %1501 = vrot.lane.b32.xlu1 %v2983_v1, %s3063_s18  ;;  %2693 = vmatprep.mubr.f32.mxu0 %v2983_v1  ;;  %v1447_v42 = vsel %vm373_vm3, %v2983_v1, 0.0 }
 0x71d   :  { %v2985_v55 = vpop.eup %2984 }
 0x71e   :  { %1503 = vrot.lane.b32.xlu0 %v2985_v55, %s3063_s18  ;;  %2694 = vmatmul.mubr.f32.gmra.mrb[30].mxu0 %v2985_v55  ;;  %v1450_v40 = vsel %vm373_vm3, %v2985_v55, 0.0 }
 0x73d   :  { %1430 = vadd.xlane.f32.xlu1 %v1429_v56 }
 0x770   :  { %v1490_v16 = vpop.permute.xlu0 %1489 }
 0x771   :  { %v1513_v18 = vsel %vm373_vm3, %v1490_v16, 0.0 }
 0x772   :  { %1514 = vadd.xlane.f32.xlu0 %v1513_v18 }
 0x774   :  { %v1492_v57 = vpop.permute.xlu1 %1491 }
 0x775   :  { %v1516_v60 = vsel %vm373_vm3, %v1492_v57, 0.0 }
 0x776   :  { %1517 = vadd.xlane.f32.xlu1 %v1516_v60  ;;  %1433 = vadd.xlane.f32.xlu0 %v1432_v36 }
 0x778   :  { %v1494_v10 = vpop.permute.xlu1 %1493 }
 0x779   :  { %v1519_v61 = vsel %vm373_vm3, %v1494_v10, 0.0 }
 0x77a   :  { %1520 = vadd.xlane.f32.xlu1 %v1519_v61  ;;  %1436 = vadd.xlane.f32.xlu0 %v1435_v48 }
 0x77e   :  { %1439 = vadd.xlane.f32.xlu0 %v1438_v63 }
 0x77f   :  { %v1496_v0 = vpop.permute.xlu0 %1495 }
 0x780   :  { %v1522_v3 = vsel %vm373_vm3, %v1496_v0, 0.0 }
 0x781   :  { %1523 = vadd.xlane.f32.xlu1 %v1522_v3 }
 0x782   :  { %1442 = vadd.xlane.f32.xlu0 %v1441_v31 }
 0x783   :  { %v1498_v4 = vpop.permute.xlu1 %1497 }
 0x784   :  { %v1525_v5 = vsel %vm373_vm3, %v1498_v4, 0.0 }
 0x785   :  { %1526 = vadd.xlane.f32.xlu1 %v1525_v5 }
 0x786   :  { %1445 = vadd.xlane.f32.xlu0 %v1444_v8 }
 0x787   :  { %v1500_v9 = vpop.permute.xlu0 %1499 }
 0x788   :  { %v1528_v35 = vsel %vm373_vm3, %v1500_v9, 0.0 }
 0x789   :  { %1529 = vadd.xlane.f32.xlu1 %v1528_v35 }
 0x78a   :  { %1448 = vadd.xlane.f32.xlu0 %v1447_v42 }
 0x78b   :  { %v1502_v11 = vpop.permute.xlu1 %1501 }
 0x78c   :  { %v1531_v15 = vsel %vm373_vm3, %v1502_v11, 0.0 }
 0x78d   :  { %1532 = vadd.xlane.f32.xlu1 %v1531_v15 }
 0x78e   :  { %1451 = vadd.xlane.f32.xlu0 %v1450_v40 }
 0x790   :  { %v1504_v19 = vpop.permute.xlu0 %1503 }
 0x791   :  { %v1534_v22 = vsel %vm373_vm3, %v1504_v19, 0.0 }
 0x792   :  { %1535 = vadd.xlane.f32.xlu1 %v1534_v22 }
 0x7ca   :  { %v1431_v32 = vpop.xlane.xlu1 %1430 }
 0x7cb   :  { %2986 = vrcp.f32 %v1431_v32 }
 0x7d5   :  { %v2686_v6 = vpop.f32.mrb[24].mxu0  ;;  %v2987_v26 = vpop.eup %2986 }
 0x7d6   :  { %v1655_v51 = vpop.f32.mrb[25].mxu0  ;;  %v1473_v34 = vmul.f32 %v2987_v26, %v3456_v50 }
 0x7e0   :  { %v3622_v27 = vpop.f32.mrb[26].mxu0 }
 0x7e1   :  { %v1665_v38 = vpop.f32.mrb[27].mxu0 }
 0x7e8   :  { %v3624_v47 = vpop.f32.mrb[28].mxu0 }
 0x7e9   :  { %v3626_v45 = vpop.f32.mrb[29].mxu0 }
 0x7f1   :  { %v3628_v29 = vpop.f32.mrb[30].mxu0 }
 0x7f2   :  { %v3630_v30 = vpop.f32.mrb[31].mxu0 }
 0x7ff   :  { %v1515_v52 = vpop.xlane.xlu0 %1514 }
 0x800   :  { %2988 = vrcp.f32 %v1515_v52 }
 0x803   :  { %v1518_v59 = vpop.xlane.xlu1 %1517  ;;  %v1434_v41 = vpop.xlane.xlu0 %1433 }
 0x804   :  { %2990 = vrcp.f32 %v1518_v59 }
 0x805   :  { %2992 = vrcp.f32 %v1434_v41 }
 0x807   :  { %v1521_v43 = vpop.xlane.xlu1 %1520  ;;  %v1437_v44 = vpop.xlane.xlu0 %1436 }
 0x808   :  { %2994 = vrcp.f32 %v1521_v43 }
 0x809   :  { %2996 = vrcp.f32 %v1437_v44 }
 0x80a   :  { %v2989_v37 = vpop.eup %2988 }
 0x80b   :  { %v1557_v28 = vmul.f32 %v2989_v37, %v3460_v7  ;;  %v1440_v24 = vpop.xlane.xlu0 %1439 }
 0x80c   :  { %2998 = vrcp.f32 %v1440_v24 }
 0x80d   :  { %v1565_v20 = vadd.f32 %v1557_v28, %v1473_v34 }
 0x80e   :  { %v2991_v21 = vpop.eup %2990  ;;  %v1524_v53 = vpop.xlane.xlu1 %1523 }
 0x80f   :  { %v2993_v14 = vpop.eup %2992  ;;  %v1558_v62 = vmul.f32 %v2991_v21, %v3460_v7  ;;  %3000 = vrcp.f32 %v1524_v53  ;;  %v1443_v39 = vpop.xlane.xlu0 %1442  ;;  %v1694_v58 = vmul.f32 %v1655_v51, %v1565_v20 }
 0x810   :  { %v1474_v2 = vmul.f32 %v2993_v14, %v3456_v50  ;;  %3002 = vrcp.f32 %v1443_v39 }
 0x811   :  { %v1707_v33 = vmul.f32 %v3637_v49, %v1694_v58 }
 0x812   :  { %v2995_v1 = vpop.eup %2994  ;;  %v1566_v55 = vadd.f32 %v1558_v62, %v1474_v2  ;;  %v1527_v56 = vpop.xlane.xlu1 %1526 }
 0x813   :  { %v2997_v16 = vpop.eup %2996  ;;  %v1559_v18 = vmul.f32 %v2995_v1, %v3460_v7  ;;  %3004 = vrcp.f32 %v1527_v56  ;;  %v1446_v57 = vpop.xlane.xlu0 %1445  ;;  %v1719_v60 = vadd.f32 %v3644_v54, %v1707_v33 }
 0x814   :  { %v1695_v36 = vmul.f32 %v2686_v6, %v1566_v55  ;;  %v1475_v10 = vmul.f32 %v2997_v16, %v3456_v50  ;;  %3006 = vrcp.f32 %v1446_v57 }
 0x815   :  { %v1727_v61 = vmax.f32 %v1719_v60, 0.0 }
 0x816   :  { %v1567_v48 = vadd.f32 %v1559_v18, %v1475_v10  ;;  %v1530_v63 = vpop.xlane.xlu1 %1529  ;;  %v1708_v0 = vmul.f32 %v3637_v49, %v1695_v36  ;;  %v2999_v3 = vpop.eup %2998 }
 0x817   :  { %3008 = vrcp.f32 %v1530_v63  ;;  %2700 = vmatprep.mubr.msk.f32.mxu1 %vm33_vm0, %v1727_v61  ;;  %v1449_v31 = vpop.xlane.xlu0 %1448  ;;  %v1476_v9 = vmul.f32 %v2999_v3, %v3456_v50 }
 0x818   :  { %v1720_v4 = vadd.f32 %v3644_v54, %v1708_v0  ;;  %v1696_v5 = vmul.f32 %v1665_v38, %v1567_v48  ;;  %3010 = vrcp.f32 %v1449_v31 }
 0x819   :  { %v3001_v8 = vpop.eup %3000 }
 0x81a   :  { %v1560_v35 = vmul.f32 %v3001_v8, %v3460_v7  ;;  %v1533_v42 = vpop.xlane.xlu1 %1532  ;;  %v1728_v11 = vmax.f32 %v1720_v4, 0.0  ;;  %v1709_v15 = vmul.f32 %v3637_v49, %v1696_v5  ;;  %v3003_v40 = vpop.eup %3002 }
 0x81b   :  { %3012 = vrcp.f32 %v1533_v42  ;;  %v1452_v19 = vpop.xlane.xlu0 %1451  ;;  %v1477_v25 = vmul.f32 %v3003_v40, %v3456_v50 }
 0x81c   :  { %v1568_v22 = vadd.f32 %v1560_v35, %v1476_v9  ;;  %2701 = vmatmul.mubr.msk.f32.vlgmr.msra.gmra.mrb[20].mxu1 %vm33_vm0, %v1728_v11  ;;  %v1721_v46 = vadd.f32 %v3644_v54, %v1709_v15  ;;  %3014 = vrcp.f32 %v1452_v19 }
 0x81d   :  { %v3005_v23 = vpop.eup %3004 }
 0x81e   :  { %v1561_v6 = vmul.f32 %v3005_v23, %v3460_v7  ;;  %v1729_v38 = vmax.f32 %v1721_v46, 0.0  ;;  %v1697_v32 = vmul.f32 %v3622_v27, %v1568_v22  ;;  %v3007_v52 = vpop.eup %3006 }
 0x81f   :  { %v1536_v51 = vpop.xlane.xlu1 %1535  ;;  %v1478_v44 = vmul.f32 %v3007_v52, %v3456_v50 }
 0x820   :  { %3016 = vrcp.f32 %v1536_v51  ;;  %v1569_v59 = vadd.f32 %v1561_v6, %v1477_v25  ;;  %2703 = vmatprep.mubr.msk.f32.mxu1 %vm33_vm0, %v1729_v38  ;;  %v1710_v41 = vmul.f32 %v3637_v49, %v1697_v32 }
 0x821   :  { %v3009_v43 = vpop.eup %3008 }
 0x822   :  { %v1562_v26 = vmul.f32 %v3009_v43, %v3460_v7  ;;  %v1722_v37 = vadd.f32 %v3644_v54, %v1710_v41  ;;  %v1698_v34 = vmul.f32 %v3626_v45, %v1569_v59  ;;  %v3011_v28 = vpop.eup %3010 }
 0x823   :  { %v1479_v53 = vmul.f32 %v3011_v28, %v3456_v50 }
 0x824   :  { %v1570_v24 = vadd.f32 %v1562_v26, %v1478_v44  ;;  %v1730_v20 = vmax.f32 %v1722_v37, 0.0  ;;  %v1711_v27 = vmul.f32 %v3637_v49, %v1698_v34 }
 0x825   :  { %v3013_v21 = vpop.eup %3012 }
 0x826   :  { %v1563_v14 = vmul.f32 %v3013_v21, %v3460_v7  ;;  %2704 = vmatmul.mubr.msk.f32.gmra.mrb[22].mxu1 %vm33_vm0, %v1730_v20  ;;  %v1723_v62 = vadd.f32 %v3644_v54, %v1711_v27  ;;  %v1699_v39 = vmul.f32 %v3624_v47, %v1570_v24  ;;  %v3015_v58 = vpop.eup %3014 }
 0x827   :  { %v1480_v55 = vmul.f32 %v3015_v58, %v3456_v50 }
 0x828   :  { %v1571_v2 = vadd.f32 %v1563_v14, %v1479_v53  ;;  %v1731_v33 = vmax.f32 %v1723_v62, 0.0  ;;  %v1712_v45 = vmul.f32 %v3637_v49, %v1699_v39 }
 0x82a   :  { %v3017_v1 = vpop.eup %3016  ;;  %2706 = vmatprep.mubr.msk.f32.mxu1 %vm33_vm0, %v1731_v33  ;;  %v1724_v16 = vadd.f32 %v3644_v54, %v1712_v45  ;;  %v1700_v18 = vmul.f32 %v3630_v30, %v1571_v2  ;;  %v2361_v30 = vld [vmem:[%s3809_s4 + $0x11] ss:$0 sm:$0xff] }
 0x82b   :  { %v1564_v56 = vmul.f32 %v3017_v1, %v3460_v7 }
 0x82c   :  { %v1732_v60 = vmax.f32 %v1724_v16, 0.0  ;;  %v1713_v47 = vmul.f32 %v3637_v49, %v1700_v18 }
 0x82d   :  { %v1572_v57 = vadd.f32 %v1564_v56, %v1480_v55 }
 0x82e   :  { %2707 = vmatmul.mubr.msk.f32.gmra.mrb[24].mxu1 %vm33_vm0, %v1732_v60  ;;  %v1725_v36 = vadd.f32 %v3644_v54, %v1713_v47 }
 0x82f   :  { %v1701_v10 = vmul.f32 %v3628_v29, %v1572_v57 }
 0x830   :  { %v1733_v61 = vmax.f32 %v1725_v36, 0.0 }
 0x831   :  { %v1714_v50 = vmul.f32 %v3637_v49, %v1701_v10 }
 0x832   :  { %2709 = vmatprep.mubr.msk.f32.mxu1 %vm33_vm0, %v1733_v61  ;;  %v3050_v61 = vld [vmem:[%s3807_s1 + $0x8] sm:$0xff] }
 0x833   :  { %v1726_v7 = vadd.f32 %v3644_v54, %v1714_v50 }
 0x835   :  { %v1734_v48 = vmax.f32 %v1726_v7, 0.0  ;;  %v3051_v7 = vld [vmem:[%s3807_s1] sm:$0xff] }
 0x837   :  { %2710 = vmatmul.mubr.msk.f32.gmra.mrb[26].mxu1 %vm33_vm0, %v1734_v48 }
 0x838   :  { %2728 = vmatprep.mubr.msk.f32.mxu1 %vm3059_vm1, %v3060_v13 }
 0x8ef   :  { %v2702_v63 = vpop.f32.mrb[20].mxu1 }
 0x8f0   :  { %v1972_v29 = vmul.f32 %v2702_v63, %v2361_v30  ;;  %v1830_v0 = vpop.f32.mrb[21].mxu1 }
 0x8f1   :  { %v2868_v54 = vpack.c.bf16 %v2702_v63, %v1830_v0  ;;  %v1971_v3 = vmul.f32 %v2361_v30, %v1830_v0 }
 0x8f2   :  { %v1982_v31 = vsel %vm1869_vm5, %v1972_v29, 0.0 }
 0x8f3   :  { %1983 = vadd.xlane.f32.xlu1 %v1982_v31  ;;  %2870 = vmatpush3.bf16.xpose.msk.msra.mxu1 %vm3694_vm6, %v2868_v54  ;;  %v1979_v13 = vsel %vm1869_vm5, %v1971_v3, 0.0  ;;  %v3052_v3 = vld [vmem:[%s3807_s1 + $0x18] sm:$0xff] }
 0x8f4   :  { %2884 = vmatprep.subr.bf16.mxu0 %v2868_v54  ;;  %1980 = vadd.xlane.f32.xlu0 %v1979_v13  ;;  %v3053_v13 = vld [vmem:[%s3807_s1 + $0x10] sm:$0xff] }
 0x8f5   :  { %2886 = vmatpush3.bf16.msra.mxu0 %v2868_v54  ;;  %2871 = vmatprep.subr.bf16.mxu1 %v3058_v12 }
 0x8f9   :  { %v2705_v4 = vpop.f32.mrb[22].mxu1 }
 0x8fa   :  { %v1974_v5 = vmul.f32 %v2705_v4, %v2361_v30  ;;  %v1840_v8 = vpop.f32.mrb[23].mxu1 }
 0x8fb   :  { %v2872_v9 = vpack.c.bf16 %v2705_v4, %v1840_v8  ;;  %v1973_v35 = vmul.f32 %v2361_v30, %v1840_v8 }
 0x8fc   :  { %v1988_v42 = vsel %vm1869_vm5, %v1974_v5, 0.0  ;;  %v3054_v5 = vld [vmem:[%s3807_s1 + $0x28] sm:$0xff] }
 0x8fd   :  { %1989 = vadd.xlane.f32.xlu1 %v1988_v42  ;;  %2874 = vmatpush3.bf16.xpose.msk.msra.mxu1 %vm3694_vm6, %v2872_v9  ;;  %v1985_v11 = vsel %vm1869_vm5, %v1973_v35, 0.0 }
 0x8fe   :  { %2888 = vmatprep.subr.bf16.mxu0 %v2872_v9  ;;  %1986 = vadd.xlane.f32.xlu0 %v1985_v11  ;;  %v3055_v11 = vld [vmem:[%s3807_s1 + $0x20] sm:$0xff] }
 0x8ff   :  { %2890 = vmatpush3.bf16.msra.mxu0 %v2872_v9  ;;  %2875 = vmatprep.subr.bf16.mxu1 %v3058_v12 }
 0x901   :  { %v2708_v15 = vpop.f32.mrb[24].mxu1 }
 0x902   :  { %v1976_v40 = vmul.f32 %v2708_v15, %v2361_v30  ;;  %v1850_v19 = vpop.f32.mrb[25].mxu1 }
 0x903   :  { %v2876_v22 = vpack.c.bf16 %v2708_v15, %v1850_v19  ;;  %v1975_v46 = vmul.f32 %v2361_v30, %v1850_v19 }
 0x904   :  { %v1994_v23 = vsel %vm1869_vm5, %v1976_v40, 0.0 }
 0x905   :  { %1995 = vadd.xlane.f32.xlu1 %v1994_v23  ;;  %2878 = vmatpush3.bf16.xpose.msk.msra.mxu1 %vm3694_vm6, %v2876_v22  ;;  %v1991_v25 = vsel %vm1869_vm5, %v1975_v46, 0.0  ;;  %v3056_v46 = vld [vmem:[%s3807_s1 + $0x38] sm:$0xff] }
 0x906   :  { %2892 = vmatprep.subr.bf16.mxu0 %v2876_v22  ;;  %1992 = vadd.xlane.f32.xlu0 %v1991_v25  ;;  %v3057_v25 = vld [vmem:[%s3807_s1 + $0x30] sm:$0xff] }
 0x907   :  { %2894 = vmatpush3.bf16.msra.mxu0 %v2876_v22  ;;  %2879 = vmatprep.subr.bf16.mxu1 %v3058_v12  ;;  %v1737_v12 = vld [vmem:[%s3809_s4 + $0x10] sm:$0x1] }
 0x90a   :  { %v2711_v6 = vpop.f32.mrb[26].mxu1 }
 0x90b   :  { %v1978_v51 = vmul.f32 %v2711_v6, %v2361_v30  ;;  %v1860_v38 = vpop.f32.mrb[27].mxu1 }
 0x90c   :  { %v2880_v32 = vpack.c.bf16 %v2711_v6, %v1860_v38  ;;  %v1977_v52 = vmul.f32 %v2361_v30, %v1860_v38 }
 0x90d   :  { %v2000_v59 = vsel %vm1869_vm5, %v1978_v51, 0.0 }
 0x90e   :  { %2001 = vadd.xlane.f32.xlu1 %v2000_v59  ;;  %2882 = vmatpush3.bf16.xpose.msk.msra.mxu1 %vm3694_vm6, %v2880_v32  ;;  %v1997_v41 = vsel %vm1869_vm5, %v1977_v52, 0.0 }
 0x90f   :  { %2896 = vmatprep.subr.bf16.mxu0 %v2880_v32  ;;  %1998 = vadd.xlane.f32.xlu0 %v1997_v41 }
 0x910   :  { %2898 = vmatpush3.bf16.msra.mxu0 %v2880_v32 }
 0x915   :  { %2729 = vmatmul.mubr.msk.f32.vlgmr.msra.gmra.mrb[28].mxu1 %vm1869_vm5, %v1737_v12 }
 0x980   :  { %v1984_v43 = vpop.xlane.xlu1 %1983 }
 0x981   :  { %v1981_v44 = vpop.xlane.xlu0 %1980 }
 0x98a   :  { %v1990_v26 = vpop.xlane.xlu1 %1989 }
 0x98b   :  { %v1987_v37 = vpop.xlane.xlu0 %1986 }
 0x992   :  { %v1996_v34 = vpop.xlane.xlu1 %1995 }
 0x993   :  { %v1993_v24 = vpop.xlane.xlu0 %1992 }
 0x99b   :  { %v2002_v39 = vpop.xlane.xlu1 %2001 }
 0x99c   :  { %v1999_v33 = vpop.xlane.xlu0 %1998 }
 0x9e8   :  { %v1963_v28 = vpop.f32.mrb[28].mxu1 }
 0x9e9   :  { %v2006_v20 = vrot.slane %v1963_v28, %v3145_v17  ;;  %v2730_v27 = vpop.f32.mrb[29].mxu1 }
 0x9eb   :  { %v2008_v21 = vadd.f32 %v2006_v20, %v1984_v43  ;;  %v2007_v53 = vadd.f32 %v2006_v20, %v1981_v44  ;;  %v2010_v14 = vadd.f32 %v2006_v20, %v1990_v26  ;;  %v2009_v62 = vadd.f32 %v2006_v20, %v1987_v37 }
 0x9ec   :  { %v2012_v58 = vadd.f32 %v2006_v20, %v1996_v34  ;;  %v2011_v2 = vadd.f32 %v2006_v20, %v1993_v24  ;;  %v2014_v56 = vadd.f32 %v2006_v20, %v2002_v39  ;;  %v2013_v60 = vadd.f32 %v2006_v20, %v1999_v33 }
 0x9ed   :  { %v2016_v45 = vmul.f32 0.2, %v2008_v21  ;;  %v2015_v1 = vmul.f32 0.2, %v2007_v53  ;;  %v2018_v55 = vmul.f32 0.2, %v2010_v14 }
 0x9ee   :  { %v2017_v16 = vmul.f32 0.2, %v2009_v62  ;;  %v2020_v18 = vmul.f32 0.2, %v2012_v58  ;;  %v2019_v57 = vmul.f32 0.2, %v2011_v2 }
 0x9ef   :  { %v2024_v47 = vmax.f32 %v2008_v21, %v2016_v45  ;;  %v2023_v36 = vmax.f32 %v2007_v53, %v2015_v1  ;;  %v2026_v17 = vmax.f32 %v2010_v14, %v2018_v55  ;;  %v2022_v29 = vmul.f32 0.2, %v2014_v56 }
 0x9f0   :  { %v2025_v10 = vmax.f32 %v2009_v62, %v2017_v16  ;;  %v2028_v30 = vmax.f32 %v2012_v58, %v2020_v18  ;;  %v2027_v63 = vmax.f32 %v2011_v2, %v2019_v57  ;;  %v2021_v0 = vmul.f32 0.2, %v2013_v60 }
 0x9f1   :  { %v2032_v50 = vadd.f32 %v3050_v61, %v2024_v47  ;;  %v2031_v48 = vadd.f32 %v3051_v7, %v2023_v36  ;;  %v2034_v31 = vadd.f32 %v3052_v3, %v2026_v17  ;;  %v2030_v9 = vmax.f32 %v2014_v56, %v2022_v29 }
 0x9f2   :  { %v2033_v4 = vadd.f32 %v3053_v13, %v2025_v10  ;;  %v2036_v8 = vadd.f32 %v3054_v5, %v2028_v30  ;;  %v2035_v15 = vadd.f32 %v3055_v11, %v2027_v63  ;;  %v2029_v40 = vmax.f32 %v2013_v60, %v2021_v0  ;;  %v2370_v5 = vld [vmem:[%s3809_s4 + $0x14] ss:$0 sm:$0xff] }
 0x9f3   :  { %v2042_v49 = vsel %vm373_vm3, %v2032_v50, -inf  ;;  %v2039_v54 = vsel %vm373_vm3, %v2031_v48, -inf  ;;  %v2048_v35 = vsel %vm373_vm3, %v2034_v31, -inf  ;;  %v2038_v23 = vadd.f32 %v3056_v46, %v2030_v9 }
 0x9f4   :  { %2043 = vmax.xlane.f32.xlu1 %v2042_v49  ;;  %2040 = vmax.xlane.f32.xlu0 %v2039_v54  ;;  %v2045_v42 = vsel %vm373_vm3, %v2033_v4, -inf  ;;  %v2054_v19 = vsel %vm373_vm3, %v2036_v8, -inf  ;;  %v2051_v22 = vsel %vm373_vm3, %v2035_v15, -inf  ;;  %v2037_v6 = vadd.f32 %v3057_v25, %v2029_v40 }
 0x9f5   :  { %v2060_v51 = vsel %vm373_vm3, %v2038_v23, -inf }
 0x9f6   :  { %v2057_v38 = vsel %vm373_vm3, %v2037_v6, -inf }
 0x9f8   :  { %2049 = vmax.xlane.f32.xlu1 %v2048_v35  ;;  %2046 = vmax.xlane.f32.xlu0 %v2045_v42 }
 0x9fc   :  { %2055 = vmax.xlane.f32.xlu1 %v2054_v19  ;;  %2052 = vmax.xlane.f32.xlu0 %v2051_v22 }
 0xa00   :  { %2061 = vmax.xlane.f32.xlu1 %v2060_v51  ;;  %2058 = vmax.xlane.f32.xlu0 %v2057_v38 }
 0xa81   :  { %v2044_v32 = vpop.xlane.xlu1 %2043  ;;  %v2041_v52 = vpop.xlane.xlu0 %2040 }
 0xa82   :  { %v2064_v59 = vsub.f32 %v2032_v50, %v2044_v32  ;;  %v2063_v41 = vsub.f32 %v2031_v48, %v2041_v52 }
 0xa84   :  { %v2073_v12 = vmul.f32 1.442695, %v2064_v59  ;;  %v2071_v43 = vmul.f32 1.442695, %v2063_v41 }
 0xa85   :  { %v2050_v44 = vpop.xlane.xlu1 %2049  ;;  %v2047_v26 = vpop.xlane.xlu0 %2046 }
 0xa86   :  { %3018 = vpow2.f32 %v2073_v12  ;;  %v2066_v37 = vsub.f32 %v2034_v31, %v2050_v44  ;;  %v2065_v34 = vsub.f32 %v2033_v4, %v2047_v26 }
 0xa87   :  { %3020 = vpow2.f32 %v2071_v43 }
 0xa88   :  { %v2077_v28 = vmul.f32 1.442695, %v2066_v37  ;;  %v2075_v24 = vmul.f32 1.442695, %v2065_v34 }
 0xa89   :  { %v2056_v20 = vpop.xlane.xlu1 %2055  ;;  %v2053_v27 = vpop.xlane.xlu0 %2052 }
 0xa8a   :  { %3022 = vpow2.f32 %v2077_v28  ;;  %v2068_v21 = vsub.f32 %v2036_v8, %v2056_v20  ;;  %v2067_v53 = vsub.f32 %v2035_v15, %v2053_v27 }
 0xa8b   :  { %3024 = vpow2.f32 %v2075_v24 }
 0xa8c   :  { %v2081_v14 = vmul.f32 1.442695, %v2068_v21  ;;  %v2079_v62 = vmul.f32 1.442695, %v2067_v53 }
 0xa8d   :  { %v2062_v39 = vpop.xlane.xlu1 %2061  ;;  %v2059_v58 = vpop.xlane.xlu0 %2058 }
 0xa8e   :  { %3026 = vpow2.f32 %v2081_v14  ;;  %v2070_v2 = vsub.f32 %v2038_v23, %v2062_v39  ;;  %v2069_v33 = vsub.f32 %v2037_v6, %v2059_v58 }
 0xa8f   :  { %3028 = vpow2.f32 %v2079_v62 }
 0xa90   :  { %v3019_v45 = vpop.eup %3018  ;;  %v2085_v1 = vmul.f32 1.442695, %v2070_v2  ;;  %v2083_v55 = vmul.f32 1.442695, %v2069_v33 }
 0xa91   :  { %v3021_v56 = vpop.eup %3020  ;;  %v2090_v16 = vsel %vm373_vm3, %v3019_v45, 0.0 }
 0xa92   :  { %3030 = vpow2.f32 %v2085_v1  ;;  %2747 = vmatprep.mubr.msk.f32.mxu0 %vm373_vm3, %v3021_v56  ;;  %2091 = vadd.xlane.f32.xlu1 %v2090_v16  ;;  %v2087_v18 = vsel %vm373_vm3, %v3021_v56, 0.0 }
 0xa93   :  { %3032 = vpow2.f32 %v2083_v55  ;;  %2748 = vmatmul.mubr.msk.f32.vlgmr.msra.gmra.mrb[32].mxu0 %vm373_vm3, %v3019_v45  ;;  %2088 = vadd.xlane.f32.xlu0 %v2087_v18 }
 0xa94   :  { %v3023_v57 = vpop.eup %3022 }
 0xa95   :  { %v3025_v60 = vpop.eup %3024  ;;  %v2096_v47 = vsel %vm373_vm3, %v3023_v57, 0.0 }
 0xa96   :  { %2750 = vmatprep.mubr.msk.f32.mxu0 %vm373_vm3, %v3025_v60  ;;  %2097 = vadd.xlane.f32.xlu1 %v2096_v47  ;;  %v2093_v36 = vsel %vm373_vm3, %v3025_v60, 0.0 }
 0xa97   :  { %2751 = vmatmul.mubr.msk.f32.gmra.mrb[34].mxu0 %vm373_vm3, %v3023_v57  ;;  %2094 = vadd.xlane.f32.xlu0 %v2093_v36 }
 0xa98   :  { %v3027_v17 = vpop.eup %3026 }
 0xa99   :  { %v3029_v10 = vpop.eup %3028  ;;  %v2102_v61 = vsel %vm373_vm3, %v3027_v17, 0.0 }
 0xa9a   :  { %2753 = vmatprep.mubr.msk.f32.mxu0 %vm373_vm3, %v3029_v10  ;;  %2103 = vadd.xlane.f32.xlu1 %v2102_v61  ;;  %v2099_v50 = vsel %vm373_vm3, %v3029_v10, 0.0 }
 0xa9b   :  { %2754 = vmatmul.mubr.msk.f32.gmra.mrb[36].mxu0 %vm373_vm3, %v3027_v17  ;;  %2100 = vadd.xlane.f32.xlu0 %v2099_v50 }
 0xa9c   :  { %v3031_v7 = vpop.eup %3030 }
 0xa9d   :  { %v3033_v48 = vpop.eup %3032  ;;  %v2108_v30 = vsel %vm373_vm3, %v3031_v7, 0.0 }
 0xa9e   :  { %2756 = vmatprep.mubr.msk.f32.mxu0 %vm373_vm3, %v3033_v48  ;;  %2109 = vadd.xlane.f32.xlu1 %v2108_v30  ;;  %v2105_v63 = vsel %vm373_vm3, %v3033_v48, 0.0 }
 0xa9f   :  { %2757 = vmatmul.mubr.msk.f32.gmra.mrb[38].mxu0 %vm373_vm3, %v3031_v7  ;;  %2106 = vadd.xlane.f32.xlu0 %v2105_v63 }
 0xb1f   :  { %v2092_v29 = vpop.xlane.xlu1 %2091 }
 0xb20   :  { %v2089_v0 = vpop.xlane.xlu0 %2088  ;;  %3034 = vrcp.f32 %v2092_v29 }
 0xb21   :  { %3036 = vrcp.f32 %v2089_v0 }
 0xb23   :  { %v2098_v49 = vpop.xlane.xlu1 %2097 }
 0xb24   :  { %v2095_v54 = vpop.xlane.xlu0 %2094  ;;  %3038 = vrcp.f32 %v2098_v49 }
 0xb25   :  { %3040 = vrcp.f32 %v2095_v54 }
 0xb27   :  { %v2104_v3 = vpop.xlane.xlu1 %2103 }
 0xb28   :  { %v2101_v31 = vpop.xlane.xlu0 %2100  ;;  %3042 = vrcp.f32 %v2104_v3 }
 0xb29   :  { %3044 = vrcp.f32 %v2101_v31 }
 0xb2a   :  { %v3035_v4 = vpop.eup %3034 }
 0xb2b   :  { %v2110_v13 = vpop.xlane.xlu1 %2109  ;;  %v3037_v35 = vpop.eup %3036 }
 0xb2c   :  { %v2107_v8 = vpop.xlane.xlu0 %2106  ;;  %3046 = vrcp.f32 %v2110_v13 }
 0xb2d   :  { %3048 = vrcp.f32 %v2107_v8 }
 0xb2e   :  { %v3039_v19 = vpop.eup %3038 }
 0xb2f   :  { %v3041_v23 = vpop.eup %3040 }
 0xb32   :  { %v3043_v32 = vpop.eup %3042 }
 0xb33   :  { %v3045_v41 = vpop.eup %3044 }
 0xb36   :  { %v3047_v37 = vpop.eup %3046 }
 0xb37   :  { %v3049_v24 = vpop.eup %3048 }
 0xb66   :  { %v2749_v9 = vpop.f32.mrb[32].mxu0 }
 0xb67   :  { %v2257_v42 = vmul.f32 %v3035_v4, %v2749_v9  ;;  %v2201_v11 = vpop.f32.mrb[33].mxu0 }
 0xb68   :  { %v2256_v15 = vmul.f32 %v3037_v35, %v2201_v11 }
 0xb69   :  { %v2269_v40 = vadd.f32 %v2370_v5, %v2257_v42 }
 0xb6a   :  { %v2268_v22 = vadd.f32 %v2370_v5, %v2256_v15  ;;  %v2752_v46 = vpop.f32.mrb[34].mxu0 }
 0xb6b   :  { %2277 = vst.msk [vmem:[%s3810_s5 + $0x8] sm:$0xff] %vm1869_vm5, %v2269_v40  ;;  %v2259_v25 = vmul.f32 %v3039_v19, %v2752_v46  ;;  %v2211_v6 = vpop.f32.mrb[35].mxu0 }
 0xb6c   :  { %2276 = vst.msk [vmem:[%s3810_s5] sm:$0xff] %vm1869_vm5, %v2268_v22  ;;  %v2258_v51 = vmul.f32 %v3041_v23, %v2211_v6 }
 0xb6d   :  { %v2271_v38 = vadd.f32 %v2370_v5, %v2259_v25 }
 0xb6e   :  { %v2270_v52 = vadd.f32 %v2370_v5, %v2258_v51  ;;  %v2755_v59 = vpop.f32.mrb[36].mxu0 }
 0xb6f   :  { %2279 = vst.msk [vmem:[%s3810_s5 + $0x18] sm:$0xff] %vm1869_vm5, %v2271_v38  ;;  %v2261_v12 = vmul.f32 %v3043_v32, %v2755_v59  ;;  %v2221_v43 = vpop.f32.mrb[37].mxu0 }
 0xb70   :  { %2278 = vst.msk [vmem:[%s3810_s5 + $0x10] sm:$0xff] %vm1869_vm5, %v2270_v52  ;;  %v2260_v44 = vmul.f32 %v3045_v41, %v2221_v43 }
 0xb71   :  { %v2273_v26 = vadd.f32 %v2370_v5, %v2261_v12 }
 0xb72   :  { %v2272_v34 = vadd.f32 %v2370_v5, %v2260_v44  ;;  %v2758_v28 = vpop.f32.mrb[38].mxu0 }
 0xb73   :  { %2281 = vst.msk [vmem:[%s3810_s5 + $0x28] sm:$0xff] %vm1869_vm5, %v2273_v26  ;;  %v2263_v20 = vmul.f32 %v3047_v37, %v2758_v28  ;;  %v2231_v27 = vpop.f32.mrb[39].mxu0 }
 0xb74   :  { %2280 = vst.msk [vmem:[%s3810_s5 + $0x20] sm:$0xff] %vm1869_vm5, %v2272_v34  ;;  %v2262_v21 = vmul.f32 %v3049_v24, %v2231_v27 }
 0xb75   :  { %v2275_v53 = vadd.f32 %v2370_v5, %v2263_v20 }
 0xb76   :  { %v2274_v14 = vadd.f32 %v2370_v5, %v2262_v21 }
 0xb77   :  { %2283 = vst.msk [vmem:[%s3810_s5 + $0x38] sm:$0xff] %vm1869_vm5, %v2275_v53 }
 0xb78   :  { %2282 = vst.msk [vmem:[%s3810_s5 + $0x30] sm:$0xff] %vm1869_vm5, %v2274_v14 }

</bundles_post_ra>
